<compile_context>
chip_gen: v7x
topology: tpu7x:2x2x1
jax: 0.10.0
libtpu: 0.0.40
codegen_flags: <defaults>
</compile_context>

<pallas_src>
import functools
import math

import jax
import jax.numpy as jnp
from jax.experimental import pallas as pl
from jax.experimental.pallas import tpu as pltpu


# ----------------------------------------------------------------------------
# Kernel
# ----------------------------------------------------------------------------
def _mha_block_kernel(x_ref, ln1a_ref, ln1b_ref,
                      wq_ref, bq_ref, wk_ref, bk_ref, wv_ref, bv_ref,
                      wo_ref, bo_ref,
                      ln2a_ref, ln2b_ref,
                      w1_ref, b1_ref, w2_ref, b2_ref,
                      o_ref, *, num_heads):
    x = x_ref[0].astype(jnp.float32)                    # (S, D)
    S, D = x.shape
    dk = D // num_heads
    scale = 1.0 / math.sqrt(dk)
    eps = 1e-6

    def layer_norm(t, a, b):
        # Matches the module's LayerNorm: unbiased std (divide by D-1), eps added to std.
        mean = jnp.mean(t, axis=-1, keepdims=True)
        c = t - mean
        var = jnp.sum(c * c, axis=-1, keepdims=True) * (1.0 / (D - 1))
        std = jnp.sqrt(var)
        return a * c / (std + eps) + b

    def dense(t, w_ref, b_ref):
        # bf16 x bf16 on the MXU, f32 accumulate; bias add in f32.
        return jnp.dot(t.astype(jnp.bfloat16), w_ref[...],
                       preferred_element_type=jnp.float32) + b_ref[...]

    # ---- attention sub-block -------------------------------------------------
    h1 = layer_norm(x, ln1a_ref[...], ln1b_ref[...])
    q = dense(h1, wq_ref, bq_ref)                       # (S, D) f32
    k = dense(h1, wk_ref, bk_ref)
    v = dense(h1, wv_ref, bv_ref)

    attn = jnp.zeros((S, D), jnp.float32)
    for i in range(num_heads):                          # static unroll over heads
        lo = i * dk
        qi = q[:, lo:lo + dk].astype(jnp.bfloat16)      # (S, dk)
        ki = k[:, lo:lo + dk].astype(jnp.bfloat16)
        vi = v[:, lo:lo + dk].astype(jnp.bfloat16)
        # scores = Qi @ Ki^T / sqrt(dk), contraction expressed via dot_general (no explicit transpose)
        s = jax.lax.dot_general(qi, ki, (((1,), (1,)), ((), ())),
                                preferred_element_type=jnp.float32) * scale
        s = s - jnp.max(s, axis=-1, keepdims=True)
        e = jnp.exp(s)
        p = e / jnp.sum(e, axis=-1, keepdims=True)      # (S, S) f32
        ctx = jnp.dot(p.astype(jnp.bfloat16), vi,
                      preferred_element_type=jnp.float32)  # (S, dk)
        # Output projection accumulated per head (== concat(heads) @ Wo).
        attn = attn + jnp.dot(ctx.astype(jnp.bfloat16),
                              wo_ref[lo:lo + dk, :],
                              preferred_element_type=jnp.float32)
    x1 = x + attn + bo_ref[...]                         # dropout(attn_out) + residual (dropout == id)

    # ---- feed-forward sub-block ----------------------------------------------
    h2 = layer_norm(x1, ln2a_ref[...], ln2b_ref[...])
    ff = jnp.maximum(dense(h2, w1_ref, b1_ref), 0.0)    # (S, 2D)
    ff = dense(ff, w2_ref, b2_ref)                      # (S, D)
    out = x1 + ff                                       # dropout == identity

    o_ref[0] = out.astype(o_ref.dtype)


# ----------------------------------------------------------------------------
# Wrapper
# ----------------------------------------------------------------------------
def _resident_spec(arr):
    # Full-array block with a constant index_map -> stays resident across the batch grid.
    nd = arr.ndim
    return pl.BlockSpec(arr.shape, lambda b, _nd=nd: (0,) * _nd)


def mha_block_forward(x, params, num_heads):
    """Fused MultiHeadAttentionBlock forward. x: (B, S, D) float32 -> (B, S, D) float32."""
    B, S, D = x.shape
    ordered = (params["ln1_a"], params["ln1_b"],
               params["wq"], params["bq"], params["wk"], params["bk"],
               params["wv"], params["bv"], params["wo"], params["bo"],
               params["ln2_a"], params["ln2_b"],
               params["w1"], params["b1"], params["w2"], params["b2"])
    return pl.pallas_call(
        functools.partial(_mha_block_kernel, num_heads=num_heads),
        out_shape=jax.ShapeDtypeStruct((B, S, D), jnp.float32),
        grid=(B,),
        in_specs=[pl.BlockSpec((1, S, D), lambda b: (b, 0, 0))]
                 + [_resident_spec(p) for p in ordered],
        out_specs=pl.BlockSpec((1, S, D), lambda b: (b, 0, 0)),
        compiler_params=pltpu.CompilerParams(
            dimension_semantics=("parallel",)),
    )(x, *ordered)


# ----------------------------------------------------------------------------
# Deterministic parameters + pure-JAX reference
# ----------------------------------------------------------------------------
def make_params(key, d_model, d_ff):
    ks = jax.random.split(key, 16)

    def w(k, fan_in, fan_out):
        # Weights stored bf16 (what the kernel consumes); (in, out) layout == x @ W + b.
        return (0.1 * jax.random.normal(k, (fan_in, fan_out), jnp.float32)).astype(jnp.bfloat16)

    def b(k, n):
        return 0.1 * jax.random.normal(k, (1, n), jnp.float32)

    return dict(
        ln1_a=1.0 + 0.1 * jax.random.normal(ks[0], (1, d_model), jnp.float32),
        ln1_b=0.1 * jax.random.normal(ks[1], (1, d_model), jnp.float32),
        wq=w(ks[2], d_model, d_model), bq=b(ks[3], d_model),
        wk=w(ks[4], d_model, d_model), bk=b(ks[5], d_model),
        wv=w(ks[6], d_model, d_model), bv=b(ks[7], d_model),
        wo=w(ks[8], d_model, d_model), bo=b(ks[9], d_model),
        ln2_a=1.0 + 0.1 * jax.random.normal(ks[10], (1, d_model), jnp.float32),
        ln2_b=0.1 * jax.random.normal(ks[11], (1, d_model), jnp.float32),
        w1=w(ks[12], d_model, d_ff), b1=b(ks[13], d_ff),
        w2=w(ks[14], d_ff, d_model), b2=b(ks[15], d_model),
    )


def reference_forward(x, params, num_heads):
    """Pure-JAX mirror of the PyTorch module (eval mode), precision-matched bf16 matmuls."""
    eps = 1e-6
    B, S, D = x.shape
    dk = D // num_heads
    scale = 1.0 / math.sqrt(dk)

    def layer_norm(t, a, b):
        mean = jnp.mean(t, axis=-1, keepdims=True)
        c = t - mean
        var = jnp.sum(c * c, axis=-1, keepdims=True) / (D - 1)
        return a * c / (jnp.sqrt(var) + eps) + b

    def dense(t, w, b):
        return jnp.dot(t.astype(jnp.bfloat16), w,
                       preferred_element_type=jnp.float32) + b

    h1 = layer_norm(x, params["ln1_a"], params["ln1_b"])
    q = dense(h1, params["wq"], params["bq"])
    k = dense(h1, params["wk"], params["bk"])
    v = dense(h1, params["wv"], params["bv"])
    qh = q.reshape(B, S, num_heads, dk).transpose(0, 2, 1, 3)
    kh = k.reshape(B, S, num_heads, dk).transpose(0, 2, 1, 3)
    vh = v.reshape(B, S, num_heads, dk).transpose(0, 2, 1, 3)
    scores = jnp.einsum("bhqd,bhkd->bhqk",
                        qh.astype(jnp.bfloat16), kh.astype(jnp.bfloat16),
                        preferred_element_type=jnp.float32) * scale
    p = jax.nn.softmax(scores, axis=-1)
    ctx = jnp.einsum("bhqk,bhkd->bhqd",
                     p.astype(jnp.bfloat16), vh.astype(jnp.bfloat16),
                     preferred_element_type=jnp.float32)
    ctx = ctx.transpose(0, 2, 1, 3).reshape(B, S, D)
    x1 = x + dense(ctx, params["wo"], params["bo"])
    h2 = layer_norm(x1, params["ln2_a"], params["ln2_b"])
    ff = jnp.maximum(dense(h2, params["w1"], params["b1"]), 0.0)
    ff = dense(ff, params["w2"], params["b2"])
    return x1 + ff


if __name__ == "__main__":
    key = jax.random.PRNGKey(0)
    kx, kp = jax.random.split(key)

    B, S = 2, 16          # batch, patch_number (sequence length)
    D, H = 128, 4         # individual_featured (lane-dense), head_number (d_k = 32)

    x = jax.random.normal(kx, (B, S, D), jnp.float32)
    params = make_params(kp, d_model=D, d_ff=2 * D)

    out = jax.block_until_ready(mha_block_forward(x, params, num_heads=H))
    ref = reference_forward(x, params, num_heads=H)

    assert out.shape == ref.shape
    max_err = float(jnp.max(jnp.abs(out - ref)))
    assert max_err < 5e-3, f"mismatch vs reference: {max_err}"

    print("KERNEL_OK")
</pallas_src>

<mosaic_0001>
module attributes {stable_mosaic.version = 11 : i64} {
  func.func @_mha_block_kernel(%arg0: i32, %arg1: memref<1x16x128xf32, #tpu.memory_space<vmem>>, %arg2: memref<1x128xf32, #tpu.memory_space<vmem>>, %arg3: memref<1x128xf32, #tpu.memory_space<vmem>>, %arg4: memref<128x128xbf16, #tpu.memory_space<vmem>>, %arg5: memref<1x128xf32, #tpu.memory_space<vmem>>, %arg6: memref<128x128xbf16, #tpu.memory_space<vmem>>, %arg7: memref<1x128xf32, #tpu.memory_space<vmem>>, %arg8: memref<128x128xbf16, #tpu.memory_space<vmem>>, %arg9: memref<1x128xf32, #tpu.memory_space<vmem>>, %arg10: memref<128x128xbf16, #tpu.memory_space<vmem>>, %arg11: memref<1x128xf32, #tpu.memory_space<vmem>>, %arg12: memref<1x128xf32, #tpu.memory_space<vmem>>, %arg13: memref<1x128xf32, #tpu.memory_space<vmem>>, %arg14: memref<128x256xbf16, #tpu.memory_space<vmem>>, %arg15: memref<1x256xf32, #tpu.memory_space<vmem>>, %arg16: memref<256x128xbf16, #tpu.memory_space<vmem>>, %arg17: memref<1x128xf32, #tpu.memory_space<vmem>>, %arg18: memref<1x16x128xf32, #tpu.memory_space<vmem>>) attributes {dimension_semantics = [#tpu.dimension_semantics<parallel>], iteration_bounds = array<i64: 2>, scalar_prefetch = 0 : i64, scratch_operands = 0 : i64, tpu.core_type = #tpu.core_type<tc>, window_params = [{transform_indices = @transform_0, window_bounds = array<i64: 1, 16, 128>}, {pipeline_mode = #tpu.pipeline_mode<synchronous>, transform_indices = @transform_1, window_bounds = array<i64: 1, 128>}, {pipeline_mode = #tpu.pipeline_mode<synchronous>, transform_indices = @transform_2, window_bounds = array<i64: 1, 128>}, {pipeline_mode = #tpu.pipeline_mode<synchronous>, transform_indices = @transform_3, window_bounds = array<i64: 128, 128>}, {pipeline_mode = #tpu.pipeline_mode<synchronous>, transform_indices = @transform_4, window_bounds = array<i64: 1, 128>}, {pipeline_mode = #tpu.pipeline_mode<synchronous>, transform_indices = @transform_5, window_bounds = array<i64: 128, 128>}, {pipeline_mode = #tpu.pipeline_mode<synchronous>, transform_indices = @transform_6, window_bounds = array<i64: 1, 128>}, {pipeline_mode = #tpu.pipeline_mode<synchronous>, transform_indices = @transform_7, window_bounds = array<i64: 128, 128>}, {pipeline_mode = #tpu.pipeline_mode<synchronous>, transform_indices = @transform_8, window_bounds = array<i64: 1, 128>}, {pipeline_mode = #tpu.pipeline_mode<synchronous>, transform_indices = @transform_9, window_bounds = array<i64: 128, 128>}, {pipeline_mode = #tpu.pipeline_mode<synchronous>, transform_indices = @transform_10, window_bounds = array<i64: 1, 128>}, {pipeline_mode = #tpu.pipeline_mode<synchronous>, transform_indices = @transform_11, window_bounds = array<i64: 1, 128>}, {pipeline_mode = #tpu.pipeline_mode<synchronous>, transform_indices = @transform_12, window_bounds = array<i64: 1, 128>}, {pipeline_mode = #tpu.pipeline_mode<synchronous>, transform_indices = @transform_13, window_bounds = array<i64: 128, 256>}, {pipeline_mode = #tpu.pipeline_mode<synchronous>, transform_indices = @transform_14, window_bounds = array<i64: 1, 256>}, {pipeline_mode = #tpu.pipeline_mode<synchronous>, transform_indices = @transform_15, window_bounds = array<i64: 256, 128>}, {pipeline_mode = #tpu.pipeline_mode<synchronous>, transform_indices = @transform_16, window_bounds = array<i64: 1, 128>}, {transform_indices = @transform_17, window_bounds = array<i64: 1, 16, 128>}]} {
    %c0 = arith.constant 0 : index
    %c0_0 = arith.constant 0 : index
    %c0_1 = arith.constant 0 : index
    %0 = vector.load %arg1[%c0, %c0_0, %c0_1] : memref<1x16x128xf32, #tpu.memory_space<vmem>>, vector<1x16x128xf32>
    %1 = vector.shape_cast %0 : vector<1x16x128xf32> to vector<16x128xf32>
    %c0_2 = arith.constant 0 : index
    %c0_3 = arith.constant 0 : index
    %2 = vector.load %arg2[%c0_2, %c0_3] : memref<1x128xf32, #tpu.memory_space<vmem>>, vector<1x128xf32>
    %c0_4 = arith.constant 0 : index
    %c0_5 = arith.constant 0 : index
    %3 = vector.load %arg3[%c0_4, %c0_5] : memref<1x128xf32, #tpu.memory_space<vmem>>, vector<1x128xf32>
    %cst = arith.constant dense<0.000000e+00> : vector<16xf32>
    %4 = vector.multi_reduction <add>, %1, %cst [1] : vector<16x128xf32> to vector<16xf32>
    %5 = vector.shape_cast %4 : vector<16xf32> to vector<16x1xf32>
    %cst_6 = arith.constant 1.280000e+02 : f32
    %6 = vector.broadcast %cst_6 : f32 to vector<16x1xf32>
    %7 = arith.divf %5, %6 : vector<16x1xf32>
    %8 = vector.broadcast %7 : vector<16x1xf32> to vector<16x128xf32>
    %9 = arith.subf %1, %8 : vector<16x128xf32>
    %10 = arith.mulf %9, %9 : vector<16x128xf32>
    %cst_7 = arith.constant dense<0.000000e+00> : vector<16xf32>
    %11 = vector.multi_reduction <add>, %10, %cst_7 [1] : vector<16x128xf32> to vector<16xf32>
    %12 = vector.shape_cast %11 : vector<16xf32> to vector<16x1xf32>
    %cst_8 = arith.constant 0.00787401571 : f32
    %13 = vector.broadcast %cst_8 : f32 to vector<16x1xf32>
    %14 = arith.mulf %12, %13 : vector<16x1xf32>
    %15 = math.sqrt %14 : vector<16x1xf32>
    %16 = vector.broadcast %2 : vector<1x128xf32> to vector<16x128xf32>
    %17 = arith.mulf %16, %9 : vector<16x128xf32>
    %cst_9 = arith.constant 9.99999997E-7 : f32
    %18 = vector.broadcast %cst_9 : f32 to vector<16x1xf32>
    %19 = arith.addf %15, %18 : vector<16x1xf32>
    %20 = vector.broadcast %19 : vector<16x1xf32> to vector<16x128xf32>
    %21 = arith.divf %17, %20 : vector<16x128xf32>
    %22 = vector.broadcast %3 : vector<1x128xf32> to vector<16x128xf32>
    %23 = arith.addf %21, %22 : vector<16x128xf32>
    %24 = arith.truncf %23 : vector<16x128xf32> to vector<16x128xbf16>
    %c0_10 = arith.constant 0 : index
    %c0_11 = arith.constant 0 : index
    %25 = vector.load %arg4[%c0_10, %c0_11] : memref<128x128xbf16, #tpu.memory_space<vmem>>, vector<128x128xbf16>
    %cst_12 = arith.constant dense<0.000000e+00> : vector<16x128xf32>
    %26 = tpu.matmul %24, %25, %cst_12 {dimension_numbers = #tpu.dot_dimension_numbers<[1], [0], [0], [1], [0, 0, 1, 1], [], []>} : vector<16x128xbf16>, vector<128x128xbf16>, vector<16x128xf32> -> vector<16x128xf32>
    %c0_13 = arith.constant 0 : index
    %c0_14 = arith.constant 0 : index
    %27 = vector.load %arg5[%c0_13, %c0_14] : memref<1x128xf32, #tpu.memory_space<vmem>>, vector<1x128xf32>
    %28 = vector.broadcast %27 : vector<1x128xf32> to vector<16x128xf32>
    %29 = arith.addf %26, %28 : vector<16x128xf32>
    %30 = arith.truncf %23 : vector<16x128xf32> to vector<16x128xbf16>
    %c0_15 = arith.constant 0 : index
    %c0_16 = arith.constant 0 : index
    %31 = vector.load %arg6[%c0_15, %c0_16] : memref<128x128xbf16, #tpu.memory_space<vmem>>, vector<128x128xbf16>
    %cst_17 = arith.constant dense<0.000000e+00> : vector<16x128xf32>
    %32 = tpu.matmul %30, %31, %cst_17 {dimension_numbers = #tpu.dot_dimension_numbers<[1], [0], [0], [1], [0, 0, 1, 1], [], []>} : vector<16x128xbf16>, vector<128x128xbf16>, vector<16x128xf32> -> vector<16x128xf32>
    %c0_18 = arith.constant 0 : index
    %c0_19 = arith.constant 0 : index
    %33 = vector.load %arg7[%c0_18, %c0_19] : memref<1x128xf32, #tpu.memory_space<vmem>>, vector<1x128xf32>
    %34 = vector.broadcast %33 : vector<1x128xf32> to vector<16x128xf32>
    %35 = arith.addf %32, %34 : vector<16x128xf32>
    %36 = arith.truncf %23 : vector<16x128xf32> to vector<16x128xbf16>
    %c0_20 = arith.constant 0 : index
    %c0_21 = arith.constant 0 : index
    %37 = vector.load %arg8[%c0_20, %c0_21] : memref<128x128xbf16, #tpu.memory_space<vmem>>, vector<128x128xbf16>
    %cst_22 = arith.constant dense<0.000000e+00> : vector<16x128xf32>
    %38 = tpu.matmul %36, %37, %cst_22 {dimension_numbers = #tpu.dot_dimension_numbers<[1], [0], [0], [1], [0, 0, 1, 1], [], []>} : vector<16x128xbf16>, vector<128x128xbf16>, vector<16x128xf32> -> vector<16x128xf32>
    %c0_23 = arith.constant 0 : index
    %c0_24 = arith.constant 0 : index
    %39 = vector.load %arg9[%c0_23, %c0_24] : memref<1x128xf32, #tpu.memory_space<vmem>>, vector<1x128xf32>
    %40 = vector.broadcast %39 : vector<1x128xf32> to vector<16x128xf32>
    %41 = arith.addf %38, %40 : vector<16x128xf32>
    %cst_25 = arith.constant 0.000000e+00 : f32
    %42 = vector.broadcast %cst_25 : f32 to vector<16x128xf32>
    %43 = vector.extract_strided_slice %29 {offsets = [0, 0], sizes = [16, 32], strides = [1, 1]} : vector<16x128xf32> to vector<16x32xf32>
    %44 = arith.truncf %43 : vector<16x32xf32> to vector<16x32xbf16>
    %45 = vector.extract_strided_slice %35 {offsets = [0, 0], sizes = [16, 32], strides = [1, 1]} : vector<16x128xf32> to vector<16x32xf32>
    %46 = arith.truncf %45 : vector<16x32xf32> to vector<16x32xbf16>
    %47 = vector.extract_strided_slice %41 {offsets = [0, 0], sizes = [16, 32], strides = [1, 1]} : vector<16x128xf32> to vector<16x32xf32>
    %48 = arith.truncf %47 : vector<16x32xf32> to vector<16x32xbf16>
    %cst_26 = arith.constant dense<0.000000e+00> : vector<16x16xf32>
    %49 = tpu.matmul %44, %46, %cst_26 {dimension_numbers = #tpu.dot_dimension_numbers<[1], [1], [0], [0], [0, 0, 1, 0], [], []>} : vector<16x32xbf16>, vector<16x32xbf16>, vector<16x16xf32> -> vector<16x16xf32>
    %cst_27 = arith.constant 0.176776692 : f32
    %50 = vector.broadcast %cst_27 : f32 to vector<16x16xf32>
    %51 = arith.mulf %49, %50 : vector<16x16xf32>
    %cst_28 = arith.constant dense<0xFF800000> : vector<16xf32>
    %52 = vector.multi_reduction <maximumf>, %51, %cst_28 [1] : vector<16x16xf32> to vector<16xf32>
    %53 = vector.shape_cast %52 : vector<16xf32> to vector<16x1xf32>
    %54 = vector.broadcast %53 : vector<16x1xf32> to vector<16x16xf32>
    %55 = arith.subf %51, %54 : vector<16x16xf32>
    %56 = math.exp %55 : vector<16x16xf32>
    %cst_29 = arith.constant dense<0.000000e+00> : vector<16xf32>
    %57 = vector.multi_reduction <add>, %56, %cst_29 [1] : vector<16x16xf32> to vector<16xf32>
    %58 = vector.shape_cast %57 : vector<16xf32> to vector<16x1xf32>
    %59 = vector.broadcast %58 : vector<16x1xf32> to vector<16x16xf32>
    %60 = arith.divf %56, %59 : vector<16x16xf32>
    %61 = arith.truncf %60 : vector<16x16xf32> to vector<16x16xbf16>
    %cst_30 = arith.constant dense<0.000000e+00> : vector<16x32xf32>
    %62 = tpu.matmul %61, %48, %cst_30 {dimension_numbers = #tpu.dot_dimension_numbers<[1], [0], [0], [1], [0, 0, 1, 1], [], []>} : vector<16x16xbf16>, vector<16x32xbf16>, vector<16x32xf32> -> vector<16x32xf32>
    %63 = arith.truncf %62 : vector<16x32xf32> to vector<16x32xbf16>
    %c0_31 = arith.constant 0 : index
    %c0_32 = arith.constant 0 : index
    %64 = vector.load %arg10[%c0_31, %c0_32] : memref<128x128xbf16, #tpu.memory_space<vmem>>, vector<32x128xbf16>
    %cst_33 = arith.constant dense<0.000000e+00> : vector<16x128xf32>
    %65 = tpu.matmul %63, %64, %cst_33 {dimension_numbers = #tpu.dot_dimension_numbers<[1], [0], [0], [1], [0, 0, 1, 1], [], []>} : vector<16x32xbf16>, vector<32x128xbf16>, vector<16x128xf32> -> vector<16x128xf32>
    %66 = arith.addf %42, %65 : vector<16x128xf32>
    %67 = vector.extract_strided_slice %29 {offsets = [0, 32], sizes = [16, 32], strides = [1, 1]} : vector<16x128xf32> to vector<16x32xf32>
    %68 = arith.truncf %67 : vector<16x32xf32> to vector<16x32xbf16>
    %69 = vector.extract_strided_slice %35 {offsets = [0, 32], sizes = [16, 32], strides = [1, 1]} : vector<16x128xf32> to vector<16x32xf32>
    %70 = arith.truncf %69 : vector<16x32xf32> to vector<16x32xbf16>
    %71 = vector.extract_strided_slice %41 {offsets = [0, 32], sizes = [16, 32], strides = [1, 1]} : vector<16x128xf32> to vector<16x32xf32>
    %72 = arith.truncf %71 : vector<16x32xf32> to vector<16x32xbf16>
    %cst_34 = arith.constant dense<0.000000e+00> : vector<16x16xf32>
    %73 = tpu.matmul %68, %70, %cst_34 {dimension_numbers = #tpu.dot_dimension_numbers<[1], [1], [0], [0], [0, 0, 1, 0], [], []>} : vector<16x32xbf16>, vector<16x32xbf16>, vector<16x16xf32> -> vector<16x16xf32>
    %cst_35 = arith.constant 0.176776692 : f32
    %74 = vector.broadcast %cst_35 : f32 to vector<16x16xf32>
    %75 = arith.mulf %73, %74 : vector<16x16xf32>
    %cst_36 = arith.constant dense<0xFF800000> : vector<16xf32>
    %76 = vector.multi_reduction <maximumf>, %75, %cst_36 [1] : vector<16x16xf32> to vector<16xf32>
    %77 = vector.shape_cast %76 : vector<16xf32> to vector<16x1xf32>
    %78 = vector.broadcast %77 : vector<16x1xf32> to vector<16x16xf32>
    %79 = arith.subf %75, %78 : vector<16x16xf32>
    %80 = math.exp %79 : vector<16x16xf32>
    %cst_37 = arith.constant dense<0.000000e+00> : vector<16xf32>
    %81 = vector.multi_reduction <add>, %80, %cst_37 [1] : vector<16x16xf32> to vector<16xf32>
    %82 = vector.shape_cast %81 : vector<16xf32> to vector<16x1xf32>
    %83 = vector.broadcast %82 : vector<16x1xf32> to vector<16x16xf32>
    %84 = arith.divf %80, %83 : vector<16x16xf32>
    %85 = arith.truncf %84 : vector<16x16xf32> to vector<16x16xbf16>
    %cst_38 = arith.constant dense<0.000000e+00> : vector<16x32xf32>
    %86 = tpu.matmul %85, %72, %cst_38 {dimension_numbers = #tpu.dot_dimension_numbers<[1], [0], [0], [1], [0, 0, 1, 1], [], []>} : vector<16x16xbf16>, vector<16x32xbf16>, vector<16x32xf32> -> vector<16x32xf32>
    %87 = arith.truncf %86 : vector<16x32xf32> to vector<16x32xbf16>
    %c32 = arith.constant 32 : index
    %c0_39 = arith.constant 0 : index
    %88 = vector.load %arg10[%c32, %c0_39] : memref<128x128xbf16, #tpu.memory_space<vmem>>, vector<32x128xbf16>
    %cst_40 = arith.constant dense<0.000000e+00> : vector<16x128xf32>
    %89 = tpu.matmul %87, %88, %cst_40 {dimension_numbers = #tpu.dot_dimension_numbers<[1], [0], [0], [1], [0, 0, 1, 1], [], []>} : vector<16x32xbf16>, vector<32x128xbf16>, vector<16x128xf32> -> vector<16x128xf32>
    %90 = arith.addf %66, %89 : vector<16x128xf32>
    %91 = vector.extract_strided_slice %29 {offsets = [0, 64], sizes = [16, 32], strides = [1, 1]} : vector<16x128xf32> to vector<16x32xf32>
    %92 = arith.truncf %91 : vector<16x32xf32> to vector<16x32xbf16>
    %93 = vector.extract_strided_slice %35 {offsets = [0, 64], sizes = [16, 32], strides = [1, 1]} : vector<16x128xf32> to vector<16x32xf32>
    %94 = arith.truncf %93 : vector<16x32xf32> to vector<16x32xbf16>
    %95 = vector.extract_strided_slice %41 {offsets = [0, 64], sizes = [16, 32], strides = [1, 1]} : vector<16x128xf32> to vector<16x32xf32>
    %96 = arith.truncf %95 : vector<16x32xf32> to vector<16x32xbf16>
    %cst_41 = arith.constant dense<0.000000e+00> : vector<16x16xf32>
    %97 = tpu.matmul %92, %94, %cst_41 {dimension_numbers = #tpu.dot_dimension_numbers<[1], [1], [0], [0], [0, 0, 1, 0], [], []>} : vector<16x32xbf16>, vector<16x32xbf16>, vector<16x16xf32> -> vector<16x16xf32>
    %cst_42 = arith.constant 0.176776692 : f32
    %98 = vector.broadcast %cst_42 : f32 to vector<16x16xf32>
    %99 = arith.mulf %97, %98 : vector<16x16xf32>
    %cst_43 = arith.constant dense<0xFF800000> : vector<16xf32>
    %100 = vector.multi_reduction <maximumf>, %99, %cst_43 [1] : vector<16x16xf32> to vector<16xf32>
    %101 = vector.shape_cast %100 : vector<16xf32> to vector<16x1xf32>
    %102 = vector.broadcast %101 : vector<16x1xf32> to vector<16x16xf32>
    %103 = arith.subf %99, %102 : vector<16x16xf32>
    %104 = math.exp %103 : vector<16x16xf32>
    %cst_44 = arith.constant dense<0.000000e+00> : vector<16xf32>
    %105 = vector.multi_reduction <add>, %104, %cst_44 [1] : vector<16x16xf32> to vector<16xf32>
    %106 = vector.shape_cast %105 : vector<16xf32> to vector<16x1xf32>
    %107 = vector.broadcast %106 : vector<16x1xf32> to vector<16x16xf32>
    %108 = arith.divf %104, %107 : vector<16x16xf32>
    %109 = arith.truncf %108 : vector<16x16xf32> to vector<16x16xbf16>
    %cst_45 = arith.constant dense<0.000000e+00> : vector<16x32xf32>
    %110 = tpu.matmul %109, %96, %cst_45 {dimension_numbers = #tpu.dot_dimension_numbers<[1], [0], [0], [1], [0, 0, 1, 1], [], []>} : vector<16x16xbf16>, vector<16x32xbf16>, vector<16x32xf32> -> vector<16x32xf32>
    %111 = arith.truncf %110 : vector<16x32xf32> to vector<16x32xbf16>
    %c64 = arith.constant 64 : index
    %c0_46 = arith.constant 0 : index
    %112 = vector.load %arg10[%c64, %c0_46] : memref<128x128xbf16, #tpu.memory_space<vmem>>, vector<32x128xbf16>
    %cst_47 = arith.constant dense<0.000000e+00> : vector<16x128xf32>
    %113 = tpu.matmul %111, %112, %cst_47 {dimension_numbers = #tpu.dot_dimension_numbers<[1], [0], [0], [1], [0, 0, 1, 1], [], []>} : vector<16x32xbf16>, vector<32x128xbf16>, vector<16x128xf32> -> vector<16x128xf32>
    %114 = arith.addf %90, %113 : vector<16x128xf32>
    %115 = vector.extract_strided_slice %29 {offsets = [0, 96], sizes = [16, 32], strides = [1, 1]} : vector<16x128xf32> to vector<16x32xf32>
    %116 = arith.truncf %115 : vector<16x32xf32> to vector<16x32xbf16>
    %117 = vector.extract_strided_slice %35 {offsets = [0, 96], sizes = [16, 32], strides = [1, 1]} : vector<16x128xf32> to vector<16x32xf32>
    %118 = arith.truncf %117 : vector<16x32xf32> to vector<16x32xbf16>
    %119 = vector.extract_strided_slice %41 {offsets = [0, 96], sizes = [16, 32], strides = [1, 1]} : vector<16x128xf32> to vector<16x32xf32>
    %120 = arith.truncf %119 : vector<16x32xf32> to vector<16x32xbf16>
    %cst_48 = arith.constant dense<0.000000e+00> : vector<16x16xf32>
    %121 = tpu.matmul %116, %118, %cst_48 {dimension_numbers = #tpu.dot_dimension_numbers<[1], [1], [0], [0], [0, 0, 1, 0], [], []>} : vector<16x32xbf16>, vector<16x32xbf16>, vector<16x16xf32> -> vector<16x16xf32>
    %cst_49 = arith.constant 0.176776692 : f32
    %122 = vector.broadcast %cst_49 : f32 to vector<16x16xf32>
    %123 = arith.mulf %121, %122 : vector<16x16xf32>
    %cst_50 = arith.constant dense<0xFF800000> : vector<16xf32>
    %124 = vector.multi_reduction <maximumf>, %123, %cst_50 [1] : vector<16x16xf32> to vector<16xf32>
    %125 = vector.shape_cast %124 : vector<16xf32> to vector<16x1xf32>
    %126 = vector.broadcast %125 : vector<16x1xf32> to vector<16x16xf32>
    %127 = arith.subf %123, %126 : vector<16x16xf32>
    %128 = math.exp %127 : vector<16x16xf32>
    %cst_51 = arith.constant dense<0.000000e+00> : vector<16xf32>
    %129 = vector.multi_reduction <add>, %128, %cst_51 [1] : vector<16x16xf32> to vector<16xf32>
    %130 = vector.shape_cast %129 : vector<16xf32> to vector<16x1xf32>
    %131 = vector.broadcast %130 : vector<16x1xf32> to vector<16x16xf32>
    %132 = arith.divf %128, %131 : vector<16x16xf32>
    %133 = arith.truncf %132 : vector<16x16xf32> to vector<16x16xbf16>
    %cst_52 = arith.constant dense<0.000000e+00> : vector<16x32xf32>
    %134 = tpu.matmul %133, %120, %cst_52 {dimension_numbers = #tpu.dot_dimension_numbers<[1], [0], [0], [1], [0, 0, 1, 1], [], []>} : vector<16x16xbf16>, vector<16x32xbf16>, vector<16x32xf32> -> vector<16x32xf32>
    %135 = arith.truncf %134 : vector<16x32xf32> to vector<16x32xbf16>
    %c96 = arith.constant 96 : index
    %c0_53 = arith.constant 0 : index
    %136 = vector.load %arg10[%c96, %c0_53] : memref<128x128xbf16, #tpu.memory_space<vmem>>, vector<32x128xbf16>
    %cst_54 = arith.constant dense<0.000000e+00> : vector<16x128xf32>
    %137 = tpu.matmul %135, %136, %cst_54 {dimension_numbers = #tpu.dot_dimension_numbers<[1], [0], [0], [1], [0, 0, 1, 1], [], []>} : vector<16x32xbf16>, vector<32x128xbf16>, vector<16x128xf32> -> vector<16x128xf32>
    %138 = arith.addf %114, %137 : vector<16x128xf32>
    %139 = arith.addf %1, %138 : vector<16x128xf32>
    %c0_55 = arith.constant 0 : index
    %c0_56 = arith.constant 0 : index
    %140 = vector.load %arg11[%c0_55, %c0_56] : memref<1x128xf32, #tpu.memory_space<vmem>>, vector<1x128xf32>
    %141 = vector.broadcast %140 : vector<1x128xf32> to vector<16x128xf32>
    %142 = arith.addf %139, %141 : vector<16x128xf32>
    %c0_57 = arith.constant 0 : index
    %c0_58 = arith.constant 0 : index
    %143 = vector.load %arg12[%c0_57, %c0_58] : memref<1x128xf32, #tpu.memory_space<vmem>>, vector<1x128xf32>
    %c0_59 = arith.constant 0 : index
    %c0_60 = arith.constant 0 : index
    %144 = vector.load %arg13[%c0_59, %c0_60] : memref<1x128xf32, #tpu.memory_space<vmem>>, vector<1x128xf32>
    %cst_61 = arith.constant dense<0.000000e+00> : vector<16xf32>
    %145 = vector.multi_reduction <add>, %142, %cst_61 [1] : vector<16x128xf32> to vector<16xf32>
    %146 = vector.shape_cast %145 : vector<16xf32> to vector<16x1xf32>
    %cst_62 = arith.constant 1.280000e+02 : f32
    %147 = vector.broadcast %cst_62 : f32 to vector<16x1xf32>
    %148 = arith.divf %146, %147 : vector<16x1xf32>
    %149 = vector.broadcast %148 : vector<16x1xf32> to vector<16x128xf32>
    %150 = arith.subf %142, %149 : vector<16x128xf32>
    %151 = arith.mulf %150, %150 : vector<16x128xf32>
    %cst_63 = arith.constant dense<0.000000e+00> : vector<16xf32>
    %152 = vector.multi_reduction <add>, %151, %cst_63 [1] : vector<16x128xf32> to vector<16xf32>
    %153 = vector.shape_cast %152 : vector<16xf32> to vector<16x1xf32>
    %cst_64 = arith.constant 0.00787401571 : f32
    %154 = vector.broadcast %cst_64 : f32 to vector<16x1xf32>
    %155 = arith.mulf %153, %154 : vector<16x1xf32>
    %156 = math.sqrt %155 : vector<16x1xf32>
    %157 = vector.broadcast %143 : vector<1x128xf32> to vector<16x128xf32>
    %158 = arith.mulf %157, %150 : vector<16x128xf32>
    %cst_65 = arith.constant 9.99999997E-7 : f32
    %159 = vector.broadcast %cst_65 : f32 to vector<16x1xf32>
    %160 = arith.addf %156, %159 : vector<16x1xf32>
    %161 = vector.broadcast %160 : vector<16x1xf32> to vector<16x128xf32>
    %162 = arith.divf %158, %161 : vector<16x128xf32>
    %163 = vector.broadcast %144 : vector<1x128xf32> to vector<16x128xf32>
    %164 = arith.addf %162, %163 : vector<16x128xf32>
    %165 = arith.truncf %164 : vector<16x128xf32> to vector<16x128xbf16>
    %c0_66 = arith.constant 0 : index
    %c0_67 = arith.constant 0 : index
    %166 = vector.load %arg14[%c0_66, %c0_67] : memref<128x256xbf16, #tpu.memory_space<vmem>>, vector<128x256xbf16>
    %cst_68 = arith.constant dense<0.000000e+00> : vector<16x256xf32>
    %167 = tpu.matmul %165, %166, %cst_68 {dimension_numbers = #tpu.dot_dimension_numbers<[1], [0], [0], [1], [0, 0, 1, 1], [], []>} : vector<16x128xbf16>, vector<128x256xbf16>, vector<16x256xf32> -> vector<16x256xf32>
    %c0_69 = arith.constant 0 : index
    %c0_70 = arith.constant 0 : index
    %168 = vector.load %arg15[%c0_69, %c0_70] : memref<1x256xf32, #tpu.memory_space<vmem>>, vector<1x256xf32>
    %169 = vector.broadcast %168 : vector<1x256xf32> to vector<16x256xf32>
    %170 = arith.addf %167, %169 : vector<16x256xf32>
    %cst_71 = arith.constant 0.000000e+00 : f32
    %171 = vector.broadcast %cst_71 : f32 to vector<16x256xf32>
    %172 = arith.maximumf %170, %171 : vector<16x256xf32>
    %173 = arith.truncf %172 : vector<16x256xf32> to vector<16x256xbf16>
    %c0_72 = arith.constant 0 : index
    %c0_73 = arith.constant 0 : index
    %174 = vector.load %arg16[%c0_72, %c0_73] : memref<256x128xbf16, #tpu.memory_space<vmem>>, vector<256x128xbf16>
    %cst_74 = arith.constant dense<0.000000e+00> : vector<16x128xf32>
    %175 = tpu.matmul %173, %174, %cst_74 {dimension_numbers = #tpu.dot_dimension_numbers<[1], [0], [0], [1], [0, 0, 1, 1], [], []>} : vector<16x256xbf16>, vector<256x128xbf16>, vector<16x128xf32> -> vector<16x128xf32>
    %c0_75 = arith.constant 0 : index
    %c0_76 = arith.constant 0 : index
    %176 = vector.load %arg17[%c0_75, %c0_76] : memref<1x128xf32, #tpu.memory_space<vmem>>, vector<1x128xf32>
    %177 = vector.broadcast %176 : vector<1x128xf32> to vector<16x128xf32>
    %178 = arith.addf %175, %177 : vector<16x128xf32>
    %179 = arith.addf %142, %178 : vector<16x128xf32>
    %c0_77 = arith.constant 0 : index
    %c0_78 = arith.constant 0 : index
    %c0_79 = arith.constant 0 : index
    %180 = vector.load %arg18[%c0_77, %c0_78, %c0_79] : memref<1x16x128xf32, #tpu.memory_space<vmem>>, vector<1x16x128xf32>
    %181 = vector.shape_cast %180 : vector<1x16x128xf32> to vector<16x128xf32>
    %182 = vector.shape_cast %179 : vector<16x128xf32> to vector<1x16x128xf32>
    tpu.vector_store %arg18[%c0_77, %c0_78, %c0_79], %182 {strides = array<i32>} : memref<1x16x128xf32, #tpu.memory_space<vmem>>, vector<1x16x128xf32>,
    return
  }
  func.func @transform_0(%arg0: i32) -> (i32, i32, i32) {
    %c0_i32 = arith.constant 0 : i32
    %c0_i32_0 = arith.constant 0 : i32
    %c0_i32_1 = arith.constant 0 : i32
    return %arg0, %c0_i32, %c0_i32_0 : i32, i32, i32
  }
  func.func @transform_1(%arg0: i32) -> (i32, i32) {
    %c0_i32 = arith.constant 0 : i32
    %c0_i32_0 = arith.constant 0 : i32
    %c0_i32_1 = arith.constant 0 : i32
    return %c0_i32, %c0_i32_0 : i32, i32
  }
  func.func @transform_2(%arg0: i32) -> (i32, i32) {
    %c0_i32 = arith.constant 0 : i32
    %c0_i32_0 = arith.constant 0 : i32
    %c0_i32_1 = arith.constant 0 : i32
    return %c0_i32, %c0_i32_0 : i32, i32
  }
  func.func @transform_3(%arg0: i32) -> (i32, i32) {
    %c0_i32 = arith.constant 0 : i32
    %c0_i32_0 = arith.constant 0 : i32
    %c0_i32_1 = arith.constant 0 : i32
    return %c0_i32, %c0_i32_0 : i32, i32
  }
  func.func @transform_4(%arg0: i32) -> (i32, i32) {
    %c0_i32 = arith.constant 0 : i32
    %c0_i32_0 = arith.constant 0 : i32
    %c0_i32_1 = arith.constant 0 : i32
    return %c0_i32, %c0_i32_0 : i32, i32
  }
  func.func @transform_5(%arg0: i32) -> (i32, i32) {
    %c0_i32 = arith.constant 0 : i32
    %c0_i32_0 = arith.constant 0 : i32
    %c0_i32_1 = arith.constant 0 : i32
    return %c0_i32, %c0_i32_0 : i32, i32
  }
  func.func @transform_6(%arg0: i32) -> (i32, i32) {
    %c0_i32 = arith.constant 0 : i32
    %c0_i32_0 = arith.constant 0 : i32
    %c0_i32_1 = arith.constant 0 : i32
    return %c0_i32, %c0_i32_0 : i32, i32
  }
  func.func @transform_7(%arg0: i32) -> (i32, i32) {
    %c0_i32 = arith.constant 0 : i32
    %c0_i32_0 = arith.constant 0 : i32
    %c0_i32_1 = arith.constant 0 : i32
    return %c0_i32, %c0_i32_0 : i32, i32
  }
  func.func @transform_8(%arg0: i32) -> (i32, i32) {
    %c0_i32 = arith.constant 0 : i32
    %c0_i32_0 = arith.constant 0 : i32
    %c0_i32_1 = arith.constant 0 : i32
    return %c0_i32, %c0_i32_0 : i32, i32
  }
  func.func @transform_9(%arg0: i32) -> (i32, i32) {
    %c0_i32 = arith.constant 0 : i32
    %c0_i32_0 = arith.constant 0 : i32
    %c0_i32_1 = arith.constant 0 : i32
    return %c0_i32, %c0_i32_0 : i32, i32
  }
  func.func @transform_10(%arg0: i32) -> (i32, i32) {
    %c0_i32 = arith.constant 0 : i32
    %c0_i32_0 = arith.constant 0 : i32
    %c0_i32_1 = arith.constant 0 : i32
    return %c0_i32, %c0_i32_0 : i32, i32
  }
  func.func @transform_11(%arg0: i32) -> (i32, i32) {
    %c0_i32 = arith.constant 0 : i32
    %c0_i32_0 = arith.constant 0 : i32
    %c0_i32_1 = arith.constant 0 : i32
    return %c0_i32, %c0_i32_0 : i32, i32
  }
  func.func @transform_12(%arg0: i32) -> (i32, i32) {
    %c0_i32 = arith.constant 0 : i32
    %c0_i32_0 = arith.constant 0 : i32
    %c0_i32_1 = arith.constant 0 : i32
    return %c0_i32, %c0_i32_0 : i32, i32
  }
  func.func @transform_13(%arg0: i32) -> (i32, i32) {
    %c0_i32 = arith.constant 0 : i32
    %c0_i32_0 = arith.constant 0 : i32
    %c0_i32_1 = arith.constant 0 : i32
    return %c0_i32, %c0_i32_0 : i32, i32
  }
  func.func @transform_14(%arg0: i32) -> (i32, i32) {
    %c0_i32 = arith.constant 0 : i32
    %c0_i32_0 = arith.constant 0 : i32
    %c0_i32_1 = arith.constant 0 : i32
    return %c0_i32, %c0_i32_0 : i32, i32
  }
  func.func @transform_15(%arg0: i32) -> (i32, i32) {
    %c0_i32 = arith.constant 0 : i32
    %c0_i32_0 = arith.constant 0 : i32
    %c0_i32_1 = arith.constant 0 : i32
    return %c0_i32, %c0_i32_0 : i32, i32
  }
  func.func @transform_16(%arg0: i32) -> (i32, i32) {
    %c0_i32 = arith.constant 0 : i32
    %c0_i32_0 = arith.constant 0 : i32
    %c0_i32_1 = arith.constant 0 : i32
    return %c0_i32, %c0_i32_0 : i32, i32
  }
  func.func @transform_17(%arg0: i32) -> (i32, i32, i32) {
    %c0_i32 = arith.constant 0 : i32
    %c0_i32_0 = arith.constant 0 : i32
    %c0_i32_1 = arith.constant 0 : i32
    return %arg0, %c0_i32, %c0_i32_0 : i32, i32, i32
  }
}

</mosaic_0001>

<bundles_post_ra>
// kernel: tpu_custom_call.1
= control target key start
LH: loop header
LB: loop body
LE: loop exit
PB: predicated region body
PF: predicated region fallthrough
CT: control target
= control target key end

     0   :  { %s3847_s0 = inlined_call_operand.hbm [shape: f32[2,16,128], index: 0, kind: input, shape index: {}]   ;;  %s3848_s1 = inlined_call_operand.vmem [shape: f32[1,128], index: 1, kind: input, shape index: {}]   ;;  %s3849_s2 = inlined_call_operand.vmem [shape: f32[1,128], index: 2, kind: input, shape index: {}]   ;;  %s3850_s3 = inlined_call_operand.hbm [shape: bf16[128,128], index: 3, kind: input, shape index: {}]   ;;  %s3851_s4 = inlined_call_operand.vmem [shape: f32[1,128], index: 4, kind: input, shape index: {}]   ;;  %s3852_s5 = inlined_call_operand.hbm [shape: bf16[128,128], index: 5, kind: input, shape index: {}]   ;;  %s3853_s6 = inlined_call_operand.vmem [shape: f32[1,128], index: 6, kind: input, shape index: {}]   ;;  %s3854_s7 = inlined_call_operand.hbm [shape: bf16[128,128], index: 7, kind: input, shape index: {}]   ;;  %s3855_s8 = inlined_call_operand.vmem [shape: f32[1,128], index: 8, kind: input, shape index: {}]   ;;  %s3856_s9 = inlined_call_operand.hbm [shape: bf16[128,128], index: 9, kind: input, shape index: {}]   ;;  %s3857_s10 = inlined_call_operand.vmem [shape: f32[1,128], index: 10, kind: input, shape index: {}]   ;;  %s3858_s11 = inlined_call_operand.vmem [shape: f32[1,128], index: 11, kind: input, shape index: {}]   ;;  %s3859_s12 = inlined_call_operand.vmem [shape: f32[1,128], index: 12, kind: input, shape index: {}]   ;;  %s3860_s13 = inlined_call_operand.hbm [shape: bf16[128,256], index: 13, kind: input, shape index: {}]   ;;  %s3861_s14 = inlined_call_operand.vmem [shape: f32[1,256], index: 14, kind: input, shape index: {}]   ;;  %s3862_s15 = inlined_call_operand.hbm [shape: bf16[256,128], index: 15, kind: input, shape index: {}]   ;;  %s3863_s16 = inlined_call_operand.vmem [shape: f32[1,128], index: 16, kind: input, shape index: {}]   ;;  %s3864_s17 = inlined_call_operand.hbm [shape: f32[2,16,128], index: 17, kind: output, shape index: {}]  }
   0x1   :  { %3875 = sst [smem:[#allocation20_spill]] %s3847_s0 }
   0x2   :  { %3876 = sst [smem:[#allocation21_spill]] %s3848_s1 }
   0x3   :  { %3877 = sst [smem:[#allocation22_spill]] %s3850_s3 }
   0x4   :  { %3878 = sst [smem:[#allocation23_spill]] %s3854_s7 }
   0x5   :  { %3879 = sst [smem:[#allocation24_spill]] %s3855_s8 }
   0x6   :  { %3880 = sst [smem:[#allocation25_spill]] %s3857_s10 }
   0x7   :  { %3881 = sst [smem:[#allocation26_spill]] %s3858_s11 }
   0x8   :  { %3882 = sst [smem:[#allocation27_spill]] %s3859_s12 }
   0x9   :  { %3883 = sst [smem:[#allocation28_spill]] %s3861_s14 }
   0xa   :  { %3884 = sst [smem:[#allocation29_spill]] %s3863_s16 }
   0xb   :  { %3885 = sst [smem:[#allocation30_spill]] %s3864_s17 }
   0xc   :  { %22 = vsyncpa [#allocation3], 0 }
   0xd   :  { %24 = vsyncpa [#allocation3 + $0x1], 0 }
   0xe   :  { %25 = vsyncpa [#allocation6], 0 }
   0xf   :  { %26 = vsyncpa [#allocation9], 0 }
  0x10   :  { %27 = vsyncpa [#allocation12], 0 }
  0x11   :  { %28 = vsyncpa [#allocation4], 0 }
  0x12   :  { %30 = vsyncpa [#allocation4 + $0x1], 0  ;;  %s3296_s24 = smov 0   ;;  %s3298_s25 = smov 0  }
  0x13   :  { %s3300_s26 = smov 0   ;;  %s3302_s27 = smov 0  }
  0x14 LB: > { %s3186_s28 = smov [#allocation5]   ;;  %s3317_s0 = sadd.s32 4294967295, %s3184_s27   ;;  %s3184_s27 = sphi %s3302_s27, %s3922_s27   ;;  %s3180_s26 = sphi %s3300_s26, %s3921_s26   ;;  %s3176_s25 = sphi %s3298_s25, %s3920_s25   ;;  %s3172_s24 = sphi %s3296_s24, %s3919_s24  }
  0x15   : > { %s447_s29 = sshll.u32 %s3186_s28, 4  ;;  %p2338_p0 = scmp.ge.s32.totalorder %s3184_s27, 1  ;;  %s3322_s29 = int_to_ptr.vmem [resolvable:$true] %s447_s29 }
  0x16   : > { %p3871_p1 = scmp.eq.s32.totalorder %s3317_s0, 0  ;;  %p429_p2 = scmp.lt.s32.totalorder %s3184_s27, 3 }
  0x17   : > { %s3187_s18 = smov [#allocation8]   ;;  %s3188_s20 = smov [#allocation11]  }
  0x18   : > { %p3324_p3 = pnand %p2338_p0, %p429_p2  ;;  %s479_s19 = sshll.u32 %s3187_s18, 4  ;;  %s3337_s19 = int_to_ptr.vmem [resolvable:$true] %s479_s19 }
  0x19   : > { %s517_s21 = sshll.u32 %s3188_s20, 4  ;;  %s3888_s3 = sld [smem:[#allocation22_spill]]  ;;  %s3339_s21 = int_to_ptr.vmem [resolvable:$true] %s517_s21 }
  0x1a   : > { %s3886_s30 = scalar_select %p3324_p3, 1, 0 }
  0x1b   : > { %p2695_p5 = pneg %p3324_p3 }
  0x1d   : > { %p3333_p6 = pnand %p2695_p5, %p3871_p1 }
  0x1f   : > { %s2908_s28 = scalar_lea.hbm %s3888_s3, 1024  ;;  %p3349_p8 = pneg %p3333_p6 }
  0x20   : > { %p2909_p7 = scmp.ne.s32.totalorder %s3888_s3, %s2908_s28  ;;  %p2915_p11 = scmp.lt.u32.totalorder %s2908_s28, %s3888_s3 }
  0x22   : > { %p2911_p9 = pnand %p3349_p8, %p2909_p7 }
  0x24   : > { %p2912_p10 = pneg %p2911_p9 }
  0x26   : > { %p2917_p12 = pnand %p2915_p11, %p2912_p10 }
  0x28   : > { %2920 = shalt.err (!%p2917_p12)
}
  0x29   : > { %s2921_s16 = scalar_lea.vmem %s3322_s29, 1024  ;;  %p2929_p5 = scmp.lt.s32.totalorder %s3322_s29, %s3322_s29 }
  0x2a   : > { %p2922_p13 = scmp.ne.s32.totalorder %s3322_s29, %s2921_s16  ;;  %p2930_p4 = scmp.lt.s32.totalorder %s2921_s16, %s2921_s16 }
  0x2c   : > { %p2924_p0 = pnand %p2922_p13, %p3349_p8  ;;  %p2931_p7 = por %p2930_p4, %p2929_p5 }
  0x2e   : > { %p2925_p2 = pneg %p2924_p0 }
  0x30   : > { %p2932_p9 = pnand %p2931_p7, %p2925_p2 }
  0x32   : > { %2935 = shalt.err (!%p2932_p9)
}
  0x33   : > { %s3867_s17 = smov 64   ;;  %s3869_s14 = smov 4  }
  0x34   : > { %2698 = dma.hbm_to_vmem [thread:$0]  (!%p3333_p6), %s3888_s3, 1024, %s3322_s29, [#allocation6], %s3867_s17, %s3867_s17, %s3869_s14  }
  0x35   : > { %s3890_s7 = sld [smem:[#allocation23_spill]] }
  0x3b   : > { %s2936_s16 = scalar_lea.hbm %s3890_s7, 1024 }
  0x3c   : > { %p2937_p4 = scmp.ne.s32.totalorder %s3890_s7, %s2936_s16  ;;  %p2943_p12 = scmp.lt.u32.totalorder %s2936_s16, %s3890_s7 }
  0x3e   : > { %p2939_p10 = pnand %p2937_p4, %p3349_p8 }
  0x40   : > { %p2940_p11 = pneg %p2939_p10 }
  0x42   : > { %p2945_p13 = pnand %p2943_p12, %p2940_p11 }
  0x44   : > { %2948 = shalt.err (!%p2945_p13)
}
  0x45   : > { %s2949_s29 = scalar_lea.vmem %s3337_s19, 1024  ;;  %p2957_p7 = scmp.lt.s32.totalorder %s3337_s19, %s3337_s19 }
  0x46   : > { %p2950_p0 = scmp.ne.s32.totalorder %s3337_s19, %s2949_s29  ;;  %p2958_p9 = scmp.lt.s32.totalorder %s2949_s29, %s2949_s29 }
  0x48   : > { %p2952_p2 = pnand %p2950_p0, %p3349_p8  ;;  %p2959_p4 = por %p2958_p9, %p2957_p7 }
  0x4a   : > { %p2953_p5 = pneg %p2952_p2 }
  0x4c   : > { %p2960_p10 = pnand %p2959_p4, %p2953_p5 }
  0x4e   : > { %2963 = shalt.err (!%p2960_p10)
}
  0x4f   : > { %2704 = dma.hbm_to_vmem [thread:$0]  (!%p3333_p6), %s3890_s7, 1024, %s3337_s19, [#allocation9], %s3867_s17, %s3867_s17, %s3869_s14  }
  0x50   : > { %s2964_s22 = scalar_lea.hbm %s3860_s13, 2048 }
  0x51   : > { %p2965_p11 = scmp.ne.s32.totalorder %s3860_s13, %s2964_s22  ;;  %p2971_p0 = scmp.lt.u32.totalorder %s2964_s22, %s3860_s13 }
  0x53   : > { %p2967_p12 = pnand %p2965_p11, %p3349_p8 }
  0x55   : > { %p2968_p13 = pneg %p2967_p12 }
  0x57   : > { %p2973_p2 = pnand %p2971_p0, %p2968_p13 }
  0x59   : > { %2976 = shalt.err (!%p2973_p2)
}
  0x5a   : > { %s2977_s19 = scalar_lea.vmem %s3339_s21, 2048  ;;  %p2985_p4 = scmp.lt.s32.totalorder %s3339_s21, %s3339_s21 }
  0x5b   : > { %p2978_p5 = scmp.ne.s32.totalorder %s3339_s21, %s2977_s19  ;;  %p2986_p10 = scmp.lt.s32.totalorder %s2977_s19, %s2977_s19 }
  0x5d   : > { %p2980_p7 = pnand %p2978_p5, %p3349_p8  ;;  %p2987_p11 = por %p2986_p10, %p2985_p4 }
  0x5f   : > { %p2981_p9 = pneg %p2980_p7 }
  0x61   : > { %p2988_p12 = pnand %p2987_p11, %p2981_p9 }
  0x63   : > { %2991 = shalt.err (!%p2988_p12)
}
  0x64   : > { %s3873_s29 = smov 128   ;;  %s3192_s8 = smov 8  }
  0x65   : > { %2710 = dma.hbm_to_vmem [thread:$0]  (!%p3333_p6), %s3860_s13, 2048, %s3339_s21, [#allocation12], %s3873_s29, %s3873_s29, %s3192_s8  }
  0x66   : > { %s3193_s12 = smov [#allocation7]   ;;  %s3194_s23 = smov [#allocation10]  }
  0x67   : > { %s463_s22 = sshll.u32 %s3193_s12, 4  ;;  %s495_s28 = sshll.u32 %s3194_s23, 4  ;;  %s464_s22 = int_to_ptr.vmem [resolvable:$true] %s463_s22  ;;  %s496_s28 = int_to_ptr.vmem [resolvable:$true] %s495_s28 }
  0x68   : > { %s2992_s19 = scalar_lea.hbm %s3852_s5, 1024 }
  0x69   : > { %p2993_p13 = scmp.ne.s32.totalorder %s3852_s5, %s2992_s19  ;;  %p2999_p5 = scmp.lt.u32.totalorder %s2992_s19, %s3852_s5 }
  0x6b   : > { %p2995_p0 = pnand %p2993_p13, %p3349_p8 }
  0x6d   : > { %p2996_p2 = pneg %p2995_p0 }
  0x6f   : > { %p3001_p7 = pnand %p2999_p5, %p2996_p2 }
  0x71   : > { %3004 = shalt.err (!%p3001_p7)
}
  0x72   : > { %s3005_s21 = scalar_lea.vmem %s464_s22, 1024  ;;  %p3013_p11 = scmp.lt.s32.totalorder %s464_s22, %s464_s22 }
  0x73   : > { %p3006_p9 = scmp.ne.s32.totalorder %s464_s22, %s3005_s21  ;;  %p3014_p12 = scmp.lt.s32.totalorder %s3005_s21, %s3005_s21 }
  0x75   : > { %p3008_p4 = pnand %p3006_p9, %p3349_p8  ;;  %p3015_p1 = por %p3014_p12, %p3013_p11 }
  0x77   : > { %p3009_p10 = pneg %p3008_p4 }
  0x79   : > { %p3016_p3 = pnand %p3015_p1, %p3009_p10 }
  0x7b   : > { %3019 = shalt.err (!%p3016_p3)
}
  0x7c   : > { %s3891_s17 = smov 4   ;;  %s3892_s14 = smov 64  }
  0x7d   : > { %2701 = dma.hbm_to_vmem [thread:$0]  (!%p3333_p6), %s3852_s5, 1024, %s464_s22, [#allocation6], %s3892_s14, %s3892_s14, %s3891_s17  }
  0x7e   : > { %s3020_s12 = scalar_lea.hbm %s3856_s9, 1024 }
  0x7f   : > { %p3021_p1 = scmp.ne.s32.totalorder %s3856_s9, %s3020_s12  ;;  %p3027_p0 = scmp.lt.u32.totalorder %s3020_s12, %s3856_s9 }
  0x81   : > { %p3023_p3 = pnand %p3021_p1, %p3349_p8 }
  0x83   : > { %p3024_p13 = pneg %p3023_p3 }
  0x85   : > { %p3029_p2 = pnand %p3027_p0, %p3024_p13 }
  0x87   : > { %3032 = shalt.err (!%p3029_p2)
}
  0x88   : > { %s3033_s21 = scalar_lea.vmem %s496_s28, 1024  ;;  %p3041_p4 = scmp.lt.s32.totalorder %s496_s28, %s496_s28 }
  0x89   : > { %p3034_p5 = scmp.ne.s32.totalorder %s496_s28, %s3033_s21  ;;  %p3042_p10 = scmp.lt.s32.totalorder %s3033_s21, %s3033_s21 }
  0x8b   : > { %p3036_p7 = pnand %p3034_p5, %p3349_p8  ;;  %p3043_p11 = por %p3042_p10, %p3041_p4 }
  0x8d   : > { %p3037_p9 = pneg %p3036_p7 }
  0x8f   : > { %p3044_p12 = pnand %p3043_p11, %p3037_p9 }
  0x91   : > { %3047 = shalt.err (!%p3044_p12)
}
  0x92   : > { %2707 = dma.hbm_to_vmem [thread:$0]  (!%p3333_p6), %s3856_s9, 1024, %s496_s28, [#allocation9], %s3892_s14, %s3892_s14, %s3891_s17  }
  0x93   : > { %s3195_s7 = smov [#allocation13]   ;;  %s3048_s23 = scalar_lea.hbm %s3862_s15, 2048 }
  0x94   : > { %s533_s10 = sshll.u32 %s3195_s7, 4  ;;  %p3049_p1 = scmp.ne.s32.totalorder %s3862_s15, %s3048_s23  ;;  %s534_s10 = int_to_ptr.vmem [resolvable:$true] %s533_s10 }
  0x95   : > { %p3055_p0 = scmp.lt.u32.totalorder %s3048_s23, %s3862_s15 }
  0x96   : > { %p3051_p3 = pnand %p3049_p1, %p3349_p8 }
  0x98   : > { %p3052_p13 = pneg %p3051_p3 }
  0x9a   : > { %p3057_p2 = pnand %p3055_p0, %p3052_p13 }
  0x9c   : > { %3060 = shalt.err (!%p3057_p2)
}
  0x9d   : > { %s3061_s28 = scalar_lea.vmem %s534_s10, 2048  ;;  %p3069_p4 = scmp.lt.s32.totalorder %s534_s10, %s534_s10 }
  0x9e   : > { %p3062_p5 = scmp.ne.s32.totalorder %s534_s10, %s3061_s28  ;;  %p3070_p10 = scmp.lt.s32.totalorder %s3061_s28, %s3061_s28 }
  0xa0   : > { %p3064_p7 = pnand %p3062_p5, %p3349_p8  ;;  %p3071_p11 = por %p3070_p10, %p3069_p4 }
  0xa2   : > { %p3065_p9 = pneg %p3064_p7 }
  0xa4   : > { %p3072_p12 = pnand %p3071_p11, %p3065_p9 }
  0xa6   : > { %3075 = shalt.err (!%p3072_p12)
}
  0xa7   : > { %2713 = dma.hbm_to_vmem [thread:$0]  (!%p3333_p6), %s3862_s15, 2048, %s534_s10, [#allocation12], %s3892_s14, %s3892_s14, %s3891_s17  }
  0xa8   : > { %s2337_s1 = sadd.s32 4294967294, %s3184_s27   ;;  %s3490_s18 = sadd.s32 1, %s3184_s27  }
  0xa9   : > { %s40_s7 = ssub.s32 %s3184_s27, %s3490_s18  ;;  %s43_s11 = sadd.s32 1, %s3180_s26 }
  0xaa   : > { %p41_p8 = scmp.eq.s32.totalorder %s40_s7, 0  ;;  %p50_p1 = scmp.ne.s32.totalorder %s3180_s26, %s3176_s25 }
  0xab   : > { %p51_p3 = scmp.eq.s32.totalorder %s3184_s27, 0  ;;  %p56_p13 = scmp.ne.s32.totalorder %s3176_s25, %s3172_s24 }
  0xac   : > { %s3501_s12 = scalar_select %p41_p8, %s3180_s26, %s43_s11  }
  0xad   : > { %p3503_p0 = por %p51_p3, %p50_p1  ;;  %p3894_p2 = scmp.eq.s32.totalorder %s3317_s0, 0 }
  0xae   : > { %p416_p5 = scmp.eq.s32.totalorder %s3317_s0, 1  ;;  %p422_p7 = scmp.eq.s32.totalorder %s2337_s1, 1 }
  0xaf   : > { %p3509_p6 = por %p3894_p2, %p56_p13  ;;  %p2728_p9 = scmp.lt.s32.totalorder %s3184_s27, 2 }
  0xb0   : > { %s550_s14 = sand.u32 1, %s3180_s26   ;;  %p3516_p4 = por %p416_p5, %p50_p1 }
  0xb1   : > { %p3520_p10 = por %p422_p7, %p56_p13  ;;  %s2346_s16 = sshll.u32 %s550_s14, 4 }
  0xb2   : > { %s3896_s10 = scalar_select %p3516_p4, 1, 0 }
  0xb3   : > { %s3897_s20 = scalar_select %p3520_p10, 1, 0 }
  0xb4   : > { %s2448_s19 = sshll.u32 %s3184_s27, 8  ;;  %s3898_s22 = sld [smem:[#allocation20_spill]] }
  0xb5   : > { %s554_s1 = scalar_lea.vmem [#allocation2], %s2346_s16  ;;  %p3534_p11 = pnand %p2728_p9, %p3503_p0 }
  0xb6   : > { %s561_s7 = sshll.u32 %s554_s1, 4  ;;  %s3538_s29 = scalar_lea.sflag [#allocation3], %s550_s14  ;;  %s3530_s7 = int_to_ptr.vmem [resolvable:$true] %s561_s7 }
  0xb7   : > { %p3078_p8 = pneg %p3534_p11 }
  0xba   : > { %s3528_s3 = scalar_lea.hbm %s3898_s22, %s2448_s19  ;;  %s3081_s23 = scalar_lea.hbm %s3898_s22, 512 }
  0xbb   : > { %s3076_s21 = scalar_lea.hbm %s3528_s3, 256  ;;  %p3082_p13 = scmp.lt.u32.totalorder %s3528_s3, %s3898_s22 }
  0xbc   : > { %p3077_p12 = scmp.ne.s32.totalorder %s3528_s3, %s3076_s21  ;;  %p3083_p0 = scmp.lt.u32.totalorder %s3081_s23, %s3076_s21 }
  0xbd   : > { %p3085_p5 = scmp.lt.u32.totalorder %s3076_s21, %s3528_s3 }
  0xbe   : > { %p3079_p1 = pnand %p3078_p8, %p3077_p12  ;;  %p3084_p2 = por %p3083_p0, %p3082_p13 }
  0xc0   : > { %p3080_p3 = pneg %p3079_p1  ;;  %p3086_p7 = por %p3085_p5, %p3084_p2 }
  0xc2   : > { %p3087_p9 = pnand %p3086_p7, %p3080_p3 }
  0xc4   : > { %3090 = shalt.err (!%p3087_p9)
}
  0xc5   : > { %s3091_s14 = scalar_lea.vmem %s3530_s7, 256  ;;  %s3196_s16 = smov [#allocation2]  }
  0xc6   : > { %p3092_p12 = scmp.ne.s32.totalorder %s3530_s7, %s3091_s14  ;;  %s3096_s19 = sshll.u32 %s3196_s16, 4  ;;  %s3097_s19 = int_to_ptr.vmem [resolvable:$false] %s3096_s19 }
  0xc7   : > { %s3098_s28 = scalar_lea.vmem %s3097_s19, 512  ;;  %p3099_p4 = scmp.lt.s32.totalorder %s3530_s7, %s3097_s19 }
  0xc8   : > { %p3094_p1 = pnand %p3092_p12, %p3078_p8  ;;  %p3100_p13 = scmp.lt.s32.totalorder %s3098_s28, %s3091_s14 }
  0xca   : > { %p3095_p10 = pneg %p3094_p1  ;;  %p3101_p0 = por %p3100_p13, %p3099_p4 }
  0xcc   : > { %p3102_p2 = pnand %p3101_p0, %p3095_p10 }
  0xce   : > { %3105 = shalt.err (!%p3102_p2)
}
  0xcf   : > { %s3900_s21 = smov 128   ;;  %p3901_p8 = scmp.ne.s32.totalorder %s3886_s30, 0 }
  0xd0   : > { %2717 = dma.hbm_to_vmem [thread:$0]  (!%p3534_p11), %s3528_s3, 256, %s3530_s7, %s3538_s29, %s3900_s21, %s3900_s21, %s3192_s8  }
  0xd1   : > { %573 = sbr.rel (%p3901_p8) target bundleno = 4376 (0x1118), region = 88  ;;  %s3572_s23 = sand.u32 (!%p3901_p8), 1, %s3176_s25  }
  0xd2   : > { %s2350_s1 = sshll.u32 (!%p3901_p8), %s3572_s23, 4  ;;  %s576_s14 = scalar_lea.sflag (!%p3901_p8), [#allocation3], %s3572_s23 }
  0xd3   : > { %s3578_s11 = scalar_lea.vmem (!%p3901_p8), [#allocation2], %s2350_s1 }
  0xd8   : > { %3151 = dma.done.wait (%p3509_p6), %s576_s14, 256  }
  0xd9   : > { %3153 = vsyncadd (%p3509_p6), %s576_s14, 4294967040  ;;  %p3902_p4 = scmp.eq.s32.totalorder %s3317_s0, 0 }
  0xdb   : > { %3155 = dma.done.wait (%p3902_p4), [#allocation6], 2048   ;;  %p3903_p10 = pmov %p3902_p4 }
  0xdc   : > { %p3904_p11 = pmov %p3902_p4 }
  0xdd   : > { %3157 = vsyncadd (%p3903_p10), [#allocation6], 4294965248 }
  0xde   : > { %3159 = dma.done.wait (%p3904_p11), [#allocation9], 2048   ;;  %p3905_p3 = pmov %p3902_p4 }
  0xe0   : > { %3161 = vsyncadd (%p3905_p3), [#allocation9], 4294965248  ;;  %p3906_p5 = pmov %p3905_p3 }
  0xe1   : > { %p3907_p7 = pmov %p3905_p3 }
  0xe2   : > { %3163 = dma.done.wait (%p3906_p5), [#allocation12], 4096  }
  0xe3   : > { %3165 = vsyncadd (%p3907_p7), [#allocation12], 4294963200  ;;  %v655_v0 = vld [vmem:[%s3578_s11] sm:$0xff]  ;;  %v656_v1 = vld [vmem:[%s3578_s11 + $0x8] sm:$0xff]  ;;  %v3197_v11 = vmov 0.0   ;;  %vm3198_vm0 = vmmov 0  }
  0xe4   : > { %659 = vadd.xlane.f32.xlu0 %v655_v0  ;;  %v2786_v10 = vld [vmem:[#allocation5] sm:$0xff]   ;;  %2527 = vmatprep.subr.bf16.mxu0 %v3197_v11  ;;  %v2788_v13 = vld [vmem:[#allocation5 + $0x8] sm:$0xff]   ;;  %v2790_v15 = vld [vmem:[#allocation5 + $0x10] sm:$0xff]   ;;  %s3908_s8 = sld [smem:[#allocation21_spill]]  ;;  %vm1052_vm5 = vcmask 261120   ;;  %s3909_s30 = sld [smem:[#allocation24_spill]] }
  0xe5   : > { %2547 = vmatprep.subr.bf16.mxu1 %v3197_v11  ;;  %v2787_v12 = vld [vmem:[#allocation7] sm:$0xff]   ;;  %2528 = vmatpush3.bf16.msra.mxu0 %v2786_v10  ;;  %v2789_v14 = vld [vmem:[#allocation7 + $0x8] sm:$0xff]   ;;  %v2791_v16 = vld [vmem:[#allocation7 + $0x10] sm:$0xff]   ;;  %vm1102_vm6 = vcmask 130048   ;;  %s3199_s29 = smov 96   ;;  %s3201_s17 = smov 32  }
  0xe6   : > { %2548 = vmatpush3.bf16.msra.mxu1 %v2787_v12  ;;  %2529 = vmatprep.subr.bf16.mxu0 %v3197_v11  ;;  %v2792_v17 = vld [vmem:[#allocation5 + $0x18] sm:$0xff]   ;;  %v2794_v19 = vld [vmem:[#allocation5 + $0x20] sm:$0xff]   ;;  %v2796_v21 = vld [vmem:[#allocation5 + $0x28] sm:$0xff]   ;;  %s3910_s16 = sld [smem:[#allocation25_spill]]  ;;  %s3911_s28 = sld [smem:[#allocation26_spill]] }
  0xe7   : > { %2549 = vmatprep.subr.bf16.mxu1 %v3197_v11  ;;  %v2793_v18 = vld [vmem:[#allocation7 + $0x18] sm:$0xff]   ;;  %2543 = vmatprep.mubr.msk.bf16.mxu0 %vm3198_vm0, %v3197_v11  ;;  %v2795_v20 = vld [vmem:[#allocation7 + $0x20] sm:$0xff]   ;;  %v2797_v22 = vld [vmem:[#allocation7 + $0x28] sm:$0xff]   ;;  %p3916_p9 = scmp.ne.s32.totalorder %s3896_s10, 0 }
  0xe8   : > { %661 = vadd.xlane.f32.xlu0 %v656_v1  ;;  %2563 = vmatprep.mubr.msk.bf16.mxu1 %vm3198_vm0, %v3197_v11  ;;  %v2798_v23 = vld [vmem:[#allocation5 + $0x30] sm:$0xff]   ;;  %v2800_v25 = vld [vmem:[#allocation5 + $0x38] sm:$0xff]   ;;  %v2359_v49 = vld [vmem:[%s3849_s2] ss:$0 sm:$0xff] }
  0xe9   : > { %2530 = vmatpush3.bf16.msra.mxu0 %v2788_v13  ;;  %v2799_v24 = vld [vmem:[#allocation7 + $0x30] sm:$0xff]   ;;  %v2801_v26 = vld [vmem:[#allocation7 + $0x38] sm:$0xff]   ;;  %v2802_v53 = vld [vmem:[#allocation8] sm:$0xff]  }
  0xea   : > { %2550 = vmatpush3.bf16.msra.mxu1 %v2789_v14  ;;  %2531 = vmatprep.subr.bf16.mxu0 %v3197_v11  ;;  %v2358_v43 = vld [vmem:[%s3908_s8] ss:$0 sm:$0xff]  ;;  %v2803_v55 = vld [vmem:[#allocation8 + $0x8] sm:$0xff]   ;;  %v2804_v56 = vld [vmem:[#allocation8 + $0x10] sm:$0xff]   ;;  %s3200_s8 = smov 64  }
  0xeb   : > { %2551 = vmatprep.subr.bf16.mxu1 %v3197_v11  ;;  %v2805_v57 = vld [vmem:[#allocation8 + $0x18] sm:$0xff]   ;;  %v2806_v58 = vld [vmem:[#allocation8 + $0x20] sm:$0xff]   ;;  %v2807_v59 = vld [vmem:[#allocation8 + $0x28] sm:$0xff]  }
  0xec   : > { %v2808_v60 = vld [vmem:[#allocation8 + $0x30] sm:$0xff]   ;;  %v2809_v61 = vld [vmem:[#allocation8 + $0x38] sm:$0xff]   ;;  %v2360_v62 = vld [vmem:[%s3851_s4] ss:$0 sm:$0xff] }
  0xed   : > { %2532 = vmatpush3.bf16.msra.mxu0 %v2790_v15 }
  0xee   : > { %2552 = vmatpush3.bf16.msra.mxu1 %v2791_v16  ;;  %2533 = vmatprep.subr.bf16.mxu0 %v3197_v11  ;;  %v2378_v16 = vld [vmem:[%s3909_s30] ss:$0 sm:$0xff]  ;;  %s3912_s30 = sld [smem:[#allocation27_spill]] }
  0xef   : > { %2553 = vmatprep.subr.bf16.mxu1 %v3197_v11 }
  0xf1   : > { %2534 = vmatpush3.bf16.msra.mxu0 %v2792_v17 }
  0xf2   : > { %2554 = vmatpush3.bf16.msra.mxu1 %v2793_v18  ;;  %2535 = vmatprep.subr.bf16.mxu0 %v3197_v11 }
  0xf3   : > { %2555 = vmatprep.subr.bf16.mxu1 %v3197_v11 }
  0xf5   : > { %2536 = vmatpush3.bf16.msra.mxu0 %v2794_v19 }
  0xf6   : > { %2556 = vmatpush3.bf16.msra.mxu1 %v2795_v20  ;;  %2537 = vmatprep.subr.bf16.mxu0 %v3197_v11 }
  0xf7   : > { %2557 = vmatprep.subr.bf16.mxu1 %v3197_v11 }
  0xf9   : > { %2538 = vmatpush3.bf16.msra.mxu0 %v2796_v21 }
  0xfa   : > { %2558 = vmatpush3.bf16.msra.mxu1 %v2797_v22  ;;  %2539 = vmatprep.subr.bf16.mxu0 %v3197_v11 }
  0xfb   : > { %2559 = vmatprep.subr.bf16.mxu1 %v3197_v11 }
  0xfd   : > { %2540 = vmatpush3.bf16.msra.mxu0 %v2798_v23 }
  0xfe   : > { %2560 = vmatpush3.bf16.msra.mxu1 %v2799_v24  ;;  %2541 = vmatprep.subr.bf16.mxu0 %v3197_v11 }
  0xff   : > { %2561 = vmatprep.subr.bf16.mxu1 %v3197_v11 }
 0x101   : > { %2542 = vmatpush3.bf16.msra.mxu0 %v2800_v25 }
 0x102   : > { %2562 = vmatpush3.bf16.msra.mxu1 %v2801_v26  ;;  %2567 = vmatprep.subr.bf16.mxu0 %v3197_v11 }
 0x103   : > { %2587 = vmatprep.subr.bf16.mxu1 %v3197_v11 }
 0x171   : > { %v660_v2 = vpop.xlane.xlu0 %659 }
 0x172   : > { %v664_v3 = vmul.f32 0.0078125, %v660_v2 }
 0x174   : > { %v3598_v4 = vsub.f32 %v655_v0, %v664_v3  ;;  %v2369_v0 = vld [vmem:[%s3853_s6] ss:$0 sm:$0xff] }
 0x175   : > { %v662_v5 = vpop.xlane.xlu0 %661 }
 0x176   : > { %v665_v6 = vmul.f32 0.0078125, %v662_v5  ;;  %v668_v7 = vmul.f32 %v3598_v4, %v3598_v4  ;;  %v696_v45 = vmul.f32 %v2358_v43, %v3598_v4 }
 0x178   : > { %v3602_v8 = vsub.f32 %v656_v1, %v665_v6  ;;  %670 = vadd.xlane.f32.xlu1 %v668_v7 }
 0x17a   : > { %v669_v9 = vmul.f32 %v3602_v8, %v3602_v8  ;;  %v697_v46 = vmul.f32 %v2358_v43, %v3602_v8 }
 0x17c   : > { %672 = vadd.xlane.f32.xlu1 %v669_v9 }
 0x205   : > { %v671_v27 = vpop.xlane.xlu1 %670 }
 0x206   : > { %v674_v28 = vmul.f32 0.007874016, %v671_v27 }
 0x208   : > { %2858 = vrsqrt.f32 %v674_v28  ;;  %vm678_vm1 = vcmp.eq.f32.partialorder %v674_v28, inf  ;;  %v681_v33 = vand.u32 2147483648, %v674_v28  ;;  %vm680_vm2 = vcmp.eq.f32.partialorder %v674_v28, 0.0 }
 0x209   : > { %v673_v29 = vpop.xlane.xlu1 %672 }
 0x20a   : > { %v675_v30 = vmul.f32 0.007874016, %v673_v29 }
 0x20c   : > { %2860 = vrsqrt.f32 %v675_v30  ;;  %vm685_vm3 = vcmp.eq.f32.partialorder %v675_v30, inf  ;;  %v688_v39 = vand.u32 2147483648, %v675_v30  ;;  %vm687_vm4 = vcmp.eq.f32.partialorder %v675_v30, 0.0 }
 0x212   : > { %v2859_v31 = vpop.eup %2858 }
 0x213   : > { %v677_v32 = vmul.f32 %v2859_v31, %v674_v28 }
 0x215   : > { %v679_v34 = vsel %vm678_vm1, %v674_v28, %v677_v32 }
 0x216   : > { %v2861_v35 = vpop.eup %2860  ;;  %v682_v36 = vsel %vm680_vm2, %v681_v33, %v679_v34 }
 0x217   : > { %v684_v37 = vmul.f32 %v2861_v35, %v675_v30  ;;  %v698_v38 = vadd.f32 1e-06, %v682_v36 }
 0x219   : > { %v686_v40 = vsel %vm685_vm3, %v675_v30, %v684_v37  ;;  %2862 = vrcp.f32 %v698_v38 }
 0x21a   : > { %v689_v41 = vsel %vm687_vm4, %v688_v39, %v686_v40 }
 0x21b   : > { %v699_v42 = vadd.f32 1e-06, %v689_v41 }
 0x21d   : > { %2864 = vrcp.f32 %v699_v42 }
 0x223   : > { %v2863_v44 = vpop.eup %2862 }
 0x224   : > { %v701_v47 = vmul.f32 %v2863_v44, %v696_v45 }
 0x226   : > { %v710_v51 = vadd.f32 %v2359_v49, %v701_v47 }
 0x227   : > { %v2865_v48 = vpop.eup %2864 }
 0x228   : > { %v703_v50 = vmul.f32 %v2865_v48, %v697_v46 }
 0x22a   : > { %v711_v52 = vadd.f32 %v2359_v49, %v703_v50 }
 0x22c   : > { %v712_v54 = vpack.c.bf16 %v711_v52, %v710_v51 }
 0x22e   : > { %2544 = vmatmul.mubr.bf16.vlgmr.msra.gmra.mrb[0].mxu0 %v712_v54  ;;  %2564 = vmatmul.mubr.bf16.vlgmr.msra.gmra.mrb[0].mxu1 %v712_v54 }
 0x22f   : > { %2568 = vmatpush3.bf16.msra.mxu0 %v2802_v53  ;;  %2583 = vmatprep.mubr.msk.bf16.mxu0 %vm3198_vm0, %v3197_v11 }
 0x230   : > { %2569 = vmatprep.subr.bf16.mxu0 %v3197_v11  ;;  %2589 = vmatprep.mubr.msk.bf16.mxu1 %vm3198_vm0, %v3197_v11 }
 0x233   : > { %2570 = vmatpush3.bf16.msra.mxu0 %v2803_v55 }
 0x234   : > { %2571 = vmatprep.subr.bf16.mxu0 %v3197_v11 }
 0x237   : > { %2572 = vmatpush3.bf16.msra.mxu0 %v2804_v56 }
 0x238   : > { %2573 = vmatprep.subr.bf16.mxu0 %v3197_v11 }
 0x23b   : > { %2574 = vmatpush3.bf16.msra.mxu0 %v2805_v57 }
 0x23c   : > { %2575 = vmatprep.subr.bf16.mxu0 %v3197_v11 }
 0x23f   : > { %2576 = vmatpush3.bf16.msra.mxu0 %v2806_v58 }
 0x240   : > { %2577 = vmatprep.subr.bf16.mxu0 %v3197_v11 }
 0x243   : > { %2578 = vmatpush3.bf16.msra.mxu0 %v2807_v59 }
 0x244   : > { %2579 = vmatprep.subr.bf16.mxu0 %v3197_v11 }
 0x247   : > { %2580 = vmatpush3.bf16.msra.mxu0 %v2808_v60 }
 0x248   : > { %2581 = vmatprep.subr.bf16.mxu0 %v3197_v11 }
 0x24b   : > { %2582 = vmatpush3.bf16.msra.mxu0 %v2809_v61 }
 0x24c   : > { %2611 = vmatprep.subr.bf16.mxu0 %v3197_v11 }
 0x24e   : > { %2584 = vmatmul.mubr.bf16.vlgmr.msra.gmra.mrb[4].mxu0 %v712_v54 }
 0x24f   : > { %2615 = vmatprep.mubr.msk.bf16.mxu0 %vm3198_vm0, %v3197_v11 }
 0x301   : > { %v818_v63 = vpop.f32.mrb[0].mxu0  ;;  %v930_v1 = vpop.f32.mrb[0].mxu1 }
 0x302   : > { %v2545_v2 = vpop.f32.mrb[1].mxu0  ;;  %v2565_v3 = vpop.f32.mrb[1].mxu1  ;;  %v819_v6 = vadd.f32 %v2360_v62, %v818_v63  ;;  %v931_v7 = vadd.f32 %v2369_v0, %v930_v1 }
 0x303   : > { %v821_v4 = vpop.f32.mrb[2].mxu0  ;;  %v933_v5 = vpop.f32.mrb[2].mxu1 }
 0x304   : > { %v822_v8 = vadd.f32 %v2360_v62, %v821_v4  ;;  %v934_v9 = vadd.f32 %v2369_v0, %v933_v5  ;;  %v2546_v10 = vpop.f32.mrb[3].mxu0  ;;  %v2566_v12 = vpop.f32.mrb[3].mxu1 }
 0x305   : > { %v2812_v12 = vld [vmem:[#allocation10 + $0x10] sm:$0xff]  }
 0x306   : > { %v3656_v13 = vpack.c.bf16 %v822_v8, %v819_v6  ;;  %v3658_v14 = vpack.c.bf16 %v934_v9, %v931_v7  ;;  %2612 = vmatpush3.bf16.msra.mxu0 %v2812_v12 }
 0x307   : > { %2613 = vmatprep.subr.bf16.mxu0 %v3197_v11 }
 0x308   : > { %v1057_v15 = vsel %vm1052_vm5, %v3658_v14, 0 }
 0x309   : > { %2588 = vmatpush3.bf16.xpose.msra.mxu1 %v1057_v15  ;;  %v2813_v15 = vld [vmem:[#allocation10 + $0x18] sm:$0xff]  }
 0x30a   : > { %2593 = vmatprep.subr.bf16.mxu1 %v3197_v11  ;;  %2614 = vmatpush3.bf16.msra.mxu0 %v2813_v15 }
 0x30b   : > { %2627 = vmatprep.subr.bf16.mxu0 %v3197_v11 }
 0x310   : > { %2590 = vmatmul.mubr.msk.bf16.vlgmr.msra.gmra.mrb[4].mxu1 %vm1052_vm5, %v3656_v13 }
 0x311   : > { %2595 = vmatprep.mubr.msk.bf16.mxu1 %vm3198_vm0, %v3197_v11 }
 0x321   : > { %v1042_v17 = vpop.f32.mrb[4].mxu0 }
 0x322   : > { %v2585_v18 = vpop.f32.mrb[5].mxu0  ;;  %v1043_v20 = vadd.f32 %v2378_v16, %v1042_v17 }
 0x323   : > { %v1045_v19 = vpop.f32.mrb[6].mxu0 }
 0x324   : > { %v1046_v21 = vadd.f32 %v2378_v16, %v1045_v19  ;;  %v2586_v22 = vpop.f32.mrb[7].mxu0 }
 0x326   : > { %v3670_v23 = vpack.c.bf16 %v1046_v21, %v1043_v20 }
 0x328   : > { %2594 = vmatpush3.bf16.msra.mxu1 %v3670_v23 }
 0x329   : > { %2599 = vmatprep.subr.bf16.mxu1 %v3197_v11 }
 0x3e3   : > { %v1093_v24 = vpop.f32.mrb[4].mxu1 }
 0x3e4   : > { %v1100_v25 = vmul.f32 0.17677669, %v1093_v24  ;;  %v2591_v26 = vpop.f32.mrb[5].mxu1  ;;  %v2810_v24 = vld [vmem:[#allocation10] sm:$0xff]  }
 0x3e5   : > { %v1096_v27 = vpop.f32.mrb[6].mxu1  ;;  %v2811_v26 = vld [vmem:[#allocation10 + $0x8] sm:$0xff]  }
 0x3e6   : > { %v1101_v28 = vmul.f32 0.17677669, %v1096_v27  ;;  %v2592_v29 = vpop.f32.mrb[7].mxu1  ;;  %v1103_v30 = vsel %vm1102_vm6, %v1100_v25, -inf }
 0x3e7   : > { %1104 = vmax.xlane.f32.xlu0 %v1103_v30 }
 0x3e8   : > { %v1106_v31 = vsel %vm1102_vm6, %v1101_v28, -inf }
 0x3e9   : > { %1107 = vmax.xlane.f32.xlu1 %v1106_v31 }
 0x474   : > { %v1105_v32 = vpop.xlane.xlu0 %1104 }
 0x475   : > { %v1109_v33 = vsub.f32 %v1100_v25, %v1105_v32 }
 0x476   : > { %v1108_v34 = vpop.xlane.xlu1 %1107 }
 0x477   : > { %v1111_v35 = vmul.f32 1.442695, %v1109_v33  ;;  %v1110_v36 = vsub.f32 %v1101_v28, %v1108_v34 }
 0x479   : > { %2866 = vpow2.f32 %v1111_v35  ;;  %v1113_v37 = vmul.f32 1.442695, %v1110_v36 }
 0x47b   : > { %2868 = vpow2.f32 %v1113_v37 }
 0x483   : > { %v2867_v38 = vpop.eup %2866 }
 0x484   : > { %v1115_v39 = vsel %vm1102_vm6, %v2867_v38, 0.0 }
 0x485   : > { %v2869_v40 = vpop.eup %2868  ;;  %1116 = vadd.xlane.f32.xlu0 %v1115_v39 }
 0x486   : > { %v1118_v41 = vsel %vm1102_vm6, %v2869_v40, 0.0 }
 0x487   : > { %1119 = vadd.xlane.f32.xlu1 %v1118_v41 }
 0x498   : > { %1176 = vrot.lane.b32.xlu1 %v3656_v13, %s3199_s29 }
 0x49b   : > { %1179 = vrot.lane.b32.xlu0 %v3658_v14, %s3199_s29 }
 0x512   : > { %v1117_v42 = vpop.xlane.xlu0 %1116 }
 0x513   : > { %2870 = vrcp.f32 %v1117_v42 }
 0x514   : > { %v1120_v43 = vpop.xlane.xlu1 %1119 }
 0x515   : > { %2872 = vrcp.f32 %v1120_v43 }
 0x516   : > { %v1180_v48 = vpop.permute.xlu0 %1179 }
 0x517   : > { %v1185_v50 = vsel %vm1052_vm5, %v1180_v48, 0 }
 0x518   : > { %v1177_v51 = vpop.permute.xlu1 %1176 }
 0x51d   : > { %v2871_v44 = vpop.eup %2870 }
 0x51e   : > { %v1122_v46 = vmul.f32 %v2871_v44, %v2867_v38 }
 0x51f   : > { %v2873_v45 = vpop.eup %2872 }
 0x520   : > { %v1124_v47 = vmul.f32 %v2873_v45, %v2869_v40 }
 0x522   : > { %v1125_v49 = vpack.c.bf16 %v1124_v47, %v1122_v46 }
 0x524   : > { %2596 = vmatmul.mubr.msk.bf16.vlgmr.msra.gmra.mrb[8].mxu1 %vm1102_vm6, %v1125_v49 }
 0x525   : > { %2600 = vmatpush3.bf16.xpose.msra.mxu1 %v1185_v50  ;;  %2601 = vmatprep.mubr.msk.bf16.mxu1 %vm3198_vm0, %v3197_v11 }
 0x526   : > { %2605 = vmatprep.subr.bf16.mxu1 %v3197_v11 }
 0x52c   : > { %2602 = vmatmul.mubr.msk.bf16.vlgmr.msra.gmra.mrb[12].mxu1 %vm1052_vm5, %v1177_v51 }
 0x52d   : > { %2607 = vmatprep.mubr.msk.bf16.mxu1 %vm3198_vm0, %v3197_v11 }
 0x5f7   : > { %v1163_v52 = vpop.f32.mrb[8].mxu1 }
 0x5f8   : > { %v2597_v53 = vpop.f32.mrb[9].mxu1 }
 0x5f9   : > { %v1166_v54 = vpop.f32.mrb[10].mxu1 }
 0x5fa   : > { %v1170_v55 = vpack.c.bf16 %v1166_v54, %v1163_v52  ;;  %v2598_v56 = vpop.f32.mrb[11].mxu1 }
 0x5ff   : > { %v1221_v57 = vpop.f32.mrb[12].mxu1 }
 0x600   : > { %v1228_v58 = vmul.f32 0.17677669, %v1221_v57  ;;  %v2603_v59 = vpop.f32.mrb[13].mxu1 }
 0x601   : > { %v1224_v60 = vpop.f32.mrb[14].mxu1 }
 0x602   : > { %v1229_v61 = vmul.f32 0.17677669, %v1224_v60  ;;  %v2604_v62 = vpop.f32.mrb[15].mxu1  ;;  %v1230_v63 = vsel %vm1102_vm6, %v1228_v58, -inf }
 0x603   : > { %1231 = vmax.xlane.f32.xlu1 %v1230_v63 }
 0x604   : > { %v1233_v0 = vsel %vm1102_vm6, %v1229_v61, -inf }
 0x605   : > { %1234 = vmax.xlane.f32.xlu0 %v1233_v0 }
 0x690   : > { %v1232_v1 = vpop.xlane.xlu1 %1231 }
 0x691   : > { %v1236_v2 = vsub.f32 %v1228_v58, %v1232_v1 }
 0x692   : > { %v1235_v3 = vpop.xlane.xlu0 %1234 }
 0x693   : > { %v1238_v4 = vmul.f32 1.442695, %v1236_v2  ;;  %v1237_v5 = vsub.f32 %v1229_v61, %v1235_v3 }
 0x695   : > { %2874 = vpow2.f32 %v1238_v4  ;;  %v1240_v6 = vmul.f32 1.442695, %v1237_v5 }
 0x697   : > { %2876 = vpow2.f32 %v1240_v6 }
 0x69f   : > { %v2875_v7 = vpop.eup %2874 }
 0x6a0   : > { %v1242_v8 = vsel %vm1102_vm6, %v2875_v7, 0.0 }
 0x6a1   : > { %v2877_v9 = vpop.eup %2876  ;;  %1243 = vadd.xlane.f32.xlu0 %v1242_v8 }
 0x6a2   : > { %v1245_v10 = vsel %vm1102_vm6, %v2877_v9, 0.0 }
 0x6a3   : > { %1246 = vadd.xlane.f32.xlu1 %v1245_v10 }
 0x6b4   : > { %1420 = vrot.lane.b32.xlu1 %v3658_v14, %s3200_s8 }
 0x6b7   : > { %1254 = vrot.lane.b32.xlu0 %v3670_v23, %s3199_s29 }
 0x6b8   : > { %1418 = vrot.lane.b32.xlu1 %v3656_v13, %s3200_s8 }
 0x72e   : > { %v1244_v16 = vpop.xlane.xlu0 %1243 }
 0x72f   : > { %2878 = vrcp.f32 %v1244_v16 }
 0x730   : > { %v1247_v17 = vpop.xlane.xlu1 %1246 }
 0x731   : > { %2880 = vrcp.f32 %v1247_v17 }
 0x732   : > { %v1255_v18 = vpop.permute.xlu0 %1254 }
 0x733   : > { %2606 = vmatpush3.bf16.msra.mxu1 %v1255_v18 }
 0x734   : > { %2619 = vmatprep.subr.bf16.mxu1 %v3197_v11  ;;  %v1421_v29 = vpop.permute.xlu1 %1420 }
 0x735   : > { %v1426_v33 = vsel %vm1052_vm5, %v1421_v29, 0 }
 0x738   : > { %v1419_v38 = vpop.permute.xlu1 %1418 }
 0x739   : > { %v2879_v19 = vpop.eup %2878 }
 0x73a   : > { %v1249_v21 = vmul.f32 %v2879_v19, %v2875_v7 }
 0x73b   : > { %v2881_v20 = vpop.eup %2880 }
 0x73c   : > { %v1251_v22 = vmul.f32 %v2881_v20, %v2877_v9  ;;  %v2815_v9 = vld [vmem:[#allocation10 + $0x28] sm:$0xff]  }
 0x73e   : > { %v1252_v25 = vpack.c.bf16 %v1251_v22, %v1249_v21 }
 0x740   : > { %2608 = vmatmul.mubr.msk.bf16.vlgmr.msra.gmra.mrb[16].mxu1 %vm1102_vm6, %v1252_v25 }
 0x741   : > { %2620 = vmatpush3.bf16.msra.mxu1 %v2810_v24  ;;  %2623 = vmatprep.mubr.msk.bf16.mxu1 %vm3198_vm0, %v3197_v11 }
 0x742   : > { %2621 = vmatprep.subr.bf16.mxu1 %v3197_v11 }
 0x745   : > { %2622 = vmatpush3.bf16.msra.mxu1 %v2811_v26 }
 0x746   : > { %2633 = vmatprep.subr.bf16.mxu1 %v3197_v11 }
 0x748   : > { %2624 = vmatmul.mubr.msk.bf16.vlgmr.msra.gmra.mrb[20].mxu1 %vm1052_vm5, %v1170_v55 }
 0x749   : > { %2635 = vmatprep.mubr.msk.bf16.mxu1 %vm3198_vm0, %v3197_v11 }
 0x813   : > { %v1294_v27 = vpop.f32.mrb[16].mxu1 }
 0x814   : > { %v2609_v28 = vpop.f32.mrb[17].mxu1 }
 0x815   : > { %v1297_v30 = vpop.f32.mrb[18].mxu1 }
 0x816   : > { %v1301_v31 = vpack.c.bf16 %v1297_v30, %v1294_v27  ;;  %v2610_v32 = vpop.f32.mrb[19].mxu1 }
 0x818   : > { %2616 = vmatmul.mubr.msk.bf16.vlgmr.msra.gmra.mrb[8].mxu0 %vm1052_vm5, %v1301_v31 }
 0x819   : > { %2628 = vmatpush3.bf16.xpose.msra.mxu0 %v1426_v33  ;;  %2629 = vmatprep.mubr.msk.bf16.mxu0 %vm3198_vm0, %v3197_v11 }
 0x81a   : > { %2639 = vmatprep.subr.bf16.mxu0 %v3197_v11 }
 0x81b   : > { %v1411_v34 = vpop.f32.mrb[20].mxu1 }
 0x81c   : > { %v2625_v35 = vpop.f32.mrb[21].mxu1 }
 0x81d   : > { %v1414_v36 = vpop.f32.mrb[22].mxu1 }
 0x81e   : > { %v2626_v37 = vpop.f32.mrb[23].mxu1 }
 0x81f   : > { %v2816_v37 = vld [vmem:[#allocation10 + $0x30] sm:$0xff]  }
 0x820   : > { %2630 = vmatmul.mubr.msk.bf16.vlgmr.msra.gmra.mrb[12].mxu0 %vm1052_vm5, %v1419_v38 }
 0x821   : > { %2643 = vmatprep.mubr.msk.bf16.mxu0 %vm3198_vm0, %v3197_v11 }
 0x8eb   : > { %v1355_v39 = vpop.f32.mrb[8].mxu0 }
 0x8ec   : > { %v3719_v40 = vadd.f32 %v1411_v34, %v1355_v39  ;;  %v2617_v41 = vpop.f32.mrb[9].mxu0 }
 0x8ed   : > { %v1358_v42 = vpop.f32.mrb[10].mxu0 }
 0x8ee   : > { %v3721_v43 = vadd.f32 %v1414_v36, %v1358_v42  ;;  %v2618_v44 = vpop.f32.mrb[11].mxu0 }
 0x8f3   : > { %v1462_v45 = vpop.f32.mrb[12].mxu0 }
 0x8f4   : > { %v1469_v46 = vmul.f32 0.17677669, %v1462_v45  ;;  %v2631_v47 = vpop.f32.mrb[13].mxu0 }
 0x8f5   : > { %v1465_v48 = vpop.f32.mrb[14].mxu0 }
 0x8f6   : > { %v1470_v49 = vmul.f32 0.17677669, %v1465_v48  ;;  %v2632_v50 = vpop.f32.mrb[15].mxu0  ;;  %v1471_v51 = vsel %vm1102_vm6, %v1469_v46, -inf }
 0x8f7   : > { %1472 = vmax.xlane.f32.xlu1 %v1471_v51 }
 0x8f8   : > { %v1474_v52 = vsel %vm1102_vm6, %v1470_v49, -inf }
 0x8f9   : > { %1475 = vmax.xlane.f32.xlu0 %v1474_v52 }
 0x908   : > { %1494 = vrot.lane.b32.xlu1 %v3670_v23, %s3200_s8 }
 0x90c   : > { %1604 = vrot.lane.b32.xlu1 %v3656_v13, %s3201_s17  ;;  %v2814_v13 = vld [vmem:[#allocation10 + $0x20] sm:$0xff]  }
 0x90d   : > { %2640 = vmatpush3.bf16.msra.mxu0 %v2814_v13 }
 0x90e   : > { %2641 = vmatprep.subr.bf16.mxu0 %v3197_v11 }
 0x911   : > { %2642 = vmatpush3.bf16.msra.mxu0 %v2815_v9 }
 0x912   : > { %2653 = vmatprep.subr.bf16.mxu0 %v3197_v11 }
 0x984   : > { %v1473_v53 = vpop.xlane.xlu1 %1472 }
 0x985   : > { %v1477_v54 = vsub.f32 %v1469_v46, %v1473_v53 }
 0x986   : > { %v1476_v55 = vpop.xlane.xlu0 %1475 }
 0x987   : > { %v1479_v56 = vmul.f32 1.442695, %v1477_v54  ;;  %v1478_v57 = vsub.f32 %v1470_v49, %v1476_v55 }
 0x988   : > { %v1495_v58 = vpop.permute.xlu1 %1494 }
 0x989   : > { %2882 = vpow2.f32 %v1479_v56  ;;  %v1481_v59 = vmul.f32 1.442695, %v1478_v57  ;;  %2634 = vmatpush3.bf16.msra.mxu1 %v1495_v58 }
 0x98a   : > { %2647 = vmatprep.subr.bf16.mxu1 %v3197_v11 }
 0x98b   : > { %2884 = vpow2.f32 %v1481_v59 }
 0x993   : > { %v2883_v60 = vpop.eup %2882 }
 0x994   : > { %v1483_v61 = vsel %vm1102_vm6, %v2883_v60, 0.0 }
 0x995   : > { %v2885_v62 = vpop.eup %2884  ;;  %1484 = vadd.xlane.f32.xlu0 %v1483_v61  ;;  %v2906_v61 = vld [vmem:[%s3578_s11] sm:$0xff] }
 0x996   : > { %v1486_v63 = vsel %vm1102_vm6, %v2885_v62, 0.0 }
 0x999   : > { %1487 = vadd.xlane.f32.xlu0 %v1486_v63 }
 0x9af   : > { %1606 = vrot.lane.b32.xlu0 %v3658_v14, %s3201_s17  ;;  %v1605_v14 = vpop.permute.xlu1 %1604 }
 0xa22   : > { %v1485_v0 = vpop.xlane.xlu0 %1484 }
 0xa23   : > { %2886 = vrcp.f32 %v1485_v0  ;;  %v2907_v0 = vld [vmem:[%s3578_s11 + $0x8] sm:$0xff]  ;;  %s653_s11 = scalar_lea.vmem [#allocation14], %s2350_s1  ;;  %s2194_s1 = scalar_lea.sflag [#allocation4], %s3572_s23 }
 0xa24   : > { %s2207_s19 = sshll.u32 %s653_s11, 4  ;;  %s3797_s19 = int_to_ptr.vmem [resolvable:$true] %s2207_s19 }
 0xa25   : > { %s3106_s8 = scalar_lea.vmem %s3797_s19, 256 }
 0xa26   : > { %v1488_v1 = vpop.xlane.xlu0 %1487  ;;  %p3107_p6 = scmp.ne.s32.totalorder %s3797_s19, %s3106_s8 }
 0xa27   : > { %2888 = vrcp.f32 %v1488_v1 }
 0xa28   : > { %p3108_p12 = pnand %p3107_p6, %p3916_p9 }
 0xa2a   : > { %v1607_v6 = vpop.permute.xlu0 %1606  ;;  %p3109_p1 = pneg %p3108_p12 }
 0xa2b   : > { %v1612_v8 = vsel %vm1052_vm5, %v1607_v6, 0 }
 0xa2d   : > { %v2887_v2 = vpop.eup %2886 }
 0xa2e   : > { %v1490_v4 = vmul.f32 %v2887_v2, %v2883_v60  ;;  %v2407_v60 = vld [vmem:[%s3910_s16] ss:$0 sm:$0xff]  ;;  %s3914_s16 = sld [smem:[#allocation29_spill]] }
 0xa31   : > { %v2889_v3 = vpop.eup %2888 }
 0xa32   : > { %v1492_v5 = vmul.f32 %v2889_v3, %v2885_v62 }
 0xa34   : > { %v1493_v7 = vpack.c.bf16 %v1492_v5, %v1490_v4 }
 0xa36   : > { %2636 = vmatmul.mubr.msk.bf16.vlgmr.msra.gmra.mrb[24].mxu1 %vm1102_vm6, %v1493_v7 }
 0xa37   : > { %2648 = vmatpush3.bf16.xpose.msra.mxu1 %v1612_v8  ;;  %2649 = vmatprep.mubr.msk.bf16.mxu1 %vm3198_vm0, %v3197_v11 }
 0xa38   : > { %2659 = vmatprep.subr.bf16.mxu1 %v3197_v11 }
 0xa3e   : > { %2650 = vmatmul.mubr.msk.bf16.vlgmr.msra.gmra.mrb[28].mxu1 %vm1052_vm5, %v1605_v14 }
 0xa3f   : > { %2663 = vmatprep.mubr.msk.bf16.mxu1 %vm3198_vm0, %v3197_v11  ;;  %2660 = vmatpush3.bf16.msra.mxu1 %v2816_v37  ;;  %v2847_v37 = vld [vmem:[#allocation13 + $0x10] sm:$0xff]  }
 0xa40   : > { %2661 = vmatprep.subr.bf16.mxu1 %v3197_v11 }
 0xb09   : > { %v1534_v10 = vpop.f32.mrb[24].mxu1 }
 0xb0a   : > { %v2637_v12 = vpop.f32.mrb[25].mxu1 }
 0xb0b   : > { %v1537_v15 = vpop.f32.mrb[26].mxu1  ;;  %v2820_v12 = vld [vmem:[#allocation11 + $0x4] ss:$8 sps:$4 sm:$0xff]  }
 0xb0c   : > { %v1541_v16 = vpack.c.bf16 %v1537_v15, %v1534_v10  ;;  %v2638_v17 = vpop.f32.mrb[27].mxu1  ;;  %v2818_v15 = vld [vmem:[#allocation11] ss:$8 sps:$4 sm:$0xff]  }
 0xb0d   : > { %v2821_v17 = vld [vmem:[#allocation11 + $0x10] ss:$8 sps:$4 sm:$0xff]  }
 0xb0e   : > { %2644 = vmatmul.mubr.msk.bf16.vlgmr.msra.gmra.mrb[16].mxu0 %vm1052_vm5, %v1541_v16  ;;  %v2823_v16 = vld [vmem:[#allocation11 + $0x14] ss:$8 sps:$4 sm:$0xff]  }
 0xb0f   : > { %2655 = vmatprep.mubr.msk.bf16.mxu0 %vm3198_vm0, %v3197_v11 }
 0xb11   : > { %v1648_v18 = vpop.f32.mrb[28].mxu1 }
 0xb12   : > { %v1655_v19 = vmul.f32 0.17677669, %v1648_v18  ;;  %v2651_v20 = vpop.f32.mrb[29].mxu1  ;;  %v2826_v18 = vld [vmem:[#allocation11 + $0x24] ss:$8 sps:$4 sm:$0xff]  }
 0xb13   : > { %v1651_v21 = vpop.f32.mrb[30].mxu1  ;;  %v2829_v20 = vld [vmem:[#allocation11 + $0x34] ss:$8 sps:$4 sm:$0xff]  }
 0xb14   : > { %v1656_v22 = vmul.f32 0.17677669, %v1651_v21  ;;  %v2652_v24 = vpop.f32.mrb[31].mxu1  ;;  %v1657_v25 = vsel %vm1102_vm6, %v1655_v19, -inf  ;;  %v2827_v21 = vld [vmem:[#allocation11 + $0x30] ss:$8 sps:$4 sm:$0xff]  }
 0xb15   : > { %1658 = vmax.xlane.f32.xlu1 %v1657_v25  ;;  %v2832_v24 = vld [vmem:[#allocation11 + $0x44] ss:$8 sps:$4 sm:$0xff]   ;;  %v2835_v25 = vld [vmem:[#allocation11 + $0x54] ss:$8 sps:$4 sm:$0xff]  }
 0xb16   : > { %v1660_v26 = vsel %vm1102_vm6, %v1656_v22, -inf }
 0xb17   : > { %1661 = vmax.xlane.f32.xlu0 %v1660_v26  ;;  %v2833_v26 = vld [vmem:[#allocation11 + $0x50] ss:$8 sps:$4 sm:$0xff]  }
 0xba2   : > { %v1659_v27 = vpop.xlane.xlu1 %1658 }
 0xba3   : > { %v1663_v28 = vsub.f32 %v1655_v19, %v1659_v27  ;;  %v2824_v19 = vld [vmem:[#allocation11 + $0x20] ss:$8 sps:$4 sm:$0xff]   ;;  %v3202_v27 = vmov 0  }
 0xba4   : > { %v1662_v29 = vpop.xlane.xlu0 %1661 }
 0xba5   : > { %v1665_v30 = vmul.f32 1.442695, %v1663_v28  ;;  %v1664_v31 = vsub.f32 %v1656_v22, %v1662_v29  ;;  %v2830_v22 = vld [vmem:[#allocation11 + $0x40] ss:$8 sps:$4 sm:$0xff]   ;;  %v2838_v28 = vld [vmem:[#allocation11 + $0x64] ss:$8 sps:$4 sm:$0xff]  }
 0xba6   : > { %v2836_v29 = vld [vmem:[#allocation11 + $0x60] ss:$8 sps:$4 sm:$0xff]  }
 0xba7   : > { %2890 = vpow2.f32 %v1665_v30  ;;  %v1667_v32 = vmul.f32 1.442695, %v1664_v31  ;;  %v2841_v30 = vld [vmem:[#allocation11 + $0x74] ss:$8 sps:$4 sm:$0xff]   ;;  %v2839_v31 = vld [vmem:[#allocation11 + $0x70] ss:$8 sps:$4 sm:$0xff]  }
 0xba9   : > { %2892 = vpow2.f32 %v1667_v32  ;;  %v2842_v32 = vld [vmem:[#allocation13 + $0x40] sm:$0xff]  }
 0xbb1   : > { %v2891_v33 = vpop.eup %2890 }
 0xbb2   : > { %v1669_v34 = vsel %vm1102_vm6, %v2891_v33, 0.0 }
 0xbb3   : > { %v2893_v35 = vpop.eup %2892  ;;  %1670 = vadd.xlane.f32.xlu0 %v1669_v34  ;;  %v2844_v34 = vld [vmem:[#allocation13 + $0x48] sm:$0xff]  }
 0xbb4   : > { %v1672_v36 = vsel %vm1102_vm6, %v2893_v35, 0.0 }
 0xbb5   : > { %1673 = vadd.xlane.f32.xlu1 %v1672_v36  ;;  %v2846_v36 = vld [vmem:[#allocation13 + $0x50] sm:$0xff]  }
 0xbc9   : > { %1680 = vrot.lane.b32.xlu0 %v3670_v23, %s3201_s17  ;;  %s3913_s17 = sld [smem:[#allocation28_spill]] }
 0xbe1   : > { %v1595_v38 = vpop.f32.mrb[16].mxu0 }
 0xbe2   : > { %v1602_v39 = vadd.f32 %v1595_v38, %v3719_v40  ;;  %v2645_v41 = vpop.f32.mrb[17].mxu0  ;;  %v2817_v40 = vld [vmem:[#allocation10 + $0x38] sm:$0xff]  }
 0xbe3   : > { %v1598_v42 = vpop.f32.mrb[18].mxu0  ;;  %2662 = vmatpush3.bf16.msra.mxu1 %v2817_v40  ;;  %v2848_v38 = vld [vmem:[#allocation13 + $0x58] sm:$0xff]   ;;  %v2850_v41 = vld [vmem:[#allocation13 + $0x60] sm:$0xff]  }
 0xbe4   : > { %v1603_v44 = vadd.f32 %v1598_v42, %v3721_v43  ;;  %v2646_v45 = vpop.f32.mrb[19].mxu0  ;;  %2505 = vmatprep.subr.bf16.mxu1 %v2842_v32  ;;  %v2851_v42 = vld [vmem:[#allocation13 + $0x20] sm:$0xff]  }
 0xc40   : > { %v1671_v46 = vpop.xlane.xlu0 %1670 }
 0xc41   : > { %2894 = vrcp.f32 %v1671_v46 }
 0xc42   : > { %v1674_v47 = vpop.xlane.xlu1 %1673 }
 0xc43   : > { %2896 = vrcp.f32 %v1674_v47 }
 0xc44   : > { %v1681_v48 = vpop.permute.xlu0 %1680 }
 0xc45   : > { %2654 = vmatpush3.bf16.msra.mxu0 %v1681_v48 }
 0xc46   : > { %1964 = vmatprep.subr.bf16.mxu0 %v2820_v12 }
 0xc4b   : > { %v2895_v49 = vpop.eup %2894 }
 0xc4c   : > { %v1676_v50 = vmul.f32 %v2895_v49, %v2891_v33  ;;  %v2843_v33 = vld [vmem:[#allocation13] sm:$0xff]  }
 0xc4d   : > { %v2897_v23 = vpop.eup %2896 }
 0xc4e   : > { %v1678_v51 = vmul.f32 %v2897_v23, %v2893_v35  ;;  %v2845_v35 = vld [vmem:[#allocation13 + $0x8] sm:$0xff]  }
 0xc50   : > { %v1679_v11 = vpack.c.bf16 %v1678_v51, %v1676_v50 }
 0xc52   : > { %2656 = vmatmul.mubr.msk.bf16.vlgmr.msra.gmra.mrb[20].mxu0 %vm1102_vm6, %v1679_v11 }
 0xc53   : > { %1965 = vmatpush1.bf16.msra.mxu0 %v2818_v15  ;;  %1996 = vmatprep.mubr.bf16.mxu0 %v3202_v27  ;;  %v1872_v15 = vld [vmem:[%s3913_s17] sm:$0x3] }
 0xc54   : > { %1966 = vmatprep.subr.bf16.mxu0 %v2823_v16 }
 0xc57   : > { %1967 = vmatpush1.bf16.msra.mxu0 %v2821_v17 }
 0xc58   : > { %1968 = vmatprep.subr.bf16.mxu0 %v2826_v18 }
 0xc5b   : > { %1969 = vmatpush1.bf16.msra.mxu0 %v2824_v19 }
 0xc5c   : > { %1970 = vmatprep.subr.bf16.mxu0 %v2829_v20 }
 0xc5f   : > { %1971 = vmatpush1.bf16.msra.mxu0 %v2827_v21 }
 0xc60   : > { %1972 = vmatprep.subr.bf16.mxu0 %v2832_v24 }
 0xc63   : > { %1973 = vmatpush1.bf16.msra.mxu0 %v2830_v22 }
 0xc64   : > { %1974 = vmatprep.subr.bf16.mxu0 %v2835_v25 }
 0xc67   : > { %1975 = vmatpush1.bf16.msra.mxu0 %v2833_v26 }
 0xc68   : > { %1976 = vmatprep.subr.bf16.mxu0 %v2838_v28 }
 0xc6b   : > { %1977 = vmatpush1.bf16.msra.mxu0 %v2836_v29 }
 0xc6c   : > { %1978 = vmatprep.subr.bf16.mxu0 %v2841_v30 }
 0xc6f   : > { %1979 = vmatpush1.bf16.msra.mxu0 %v2839_v31 }
 0xd25   : > { %v1720_v52 = vpop.f32.mrb[20].mxu0 }
 0xd26   : > { %v2657_v43 = vpop.f32.mrb[21].mxu0 }
 0xd27   : > { %v1723_v53 = vpop.f32.mrb[22].mxu0 }
 0xd28   : > { %v1727_v54 = vpack.c.bf16 %v1723_v53, %v1720_v52  ;;  %v2658_v55 = vpop.f32.mrb[23].mxu0 }
 0xd2a   : > { %2664 = vmatmul.mubr.msk.bf16.vlgmr.msra.gmra.mrb[32].mxu1 %vm1052_vm5, %v1727_v54 }
 0xd2b   : > { %2506 = vmatpush3.bf16.msra.mxu1 %v2843_v33 }
 0xd2c   : > { %2507 = vmatprep.subr.bf16.mxu1 %v2844_v34 }
 0xd2f   : > { %2508 = vmatpush3.bf16.msra.mxu1 %v2845_v35  ;;  %v2426_v35 = vld [vmem:[%s3914_s16] ss:$0 sm:$0xff] }
 0xd30   : > { %2509 = vmatprep.subr.bf16.mxu1 %v2846_v36 }
 0xd33   : > { %2510 = vmatpush3.bf16.msra.mxu1 %v2847_v37 }
 0xd34   : > { %2511 = vmatprep.subr.bf16.mxu1 %v2848_v38 }
 0xdfd   : > { %v1781_v56 = vpop.f32.mrb[32].mxu1 }
 0xdfe   : > { %v1788_v57 = vadd.f32 %v1781_v56, %v1602_v39  ;;  %v2665_v58 = vpop.f32.mrb[33].mxu1  ;;  %v2849_v39 = vld [vmem:[#allocation13 + $0x18] sm:$0xff]  }
 0xdff   : > { %v1784_v59 = vpop.f32.mrb[34].mxu1  ;;  %2512 = vmatpush3.bf16.msra.mxu1 %v2849_v39 }
 0xe00   : > { %v1790_v62 = vadd.f32 %v2906_v61, %v1788_v57  ;;  %v1789_v63 = vadd.f32 %v1784_v59, %v1603_v44  ;;  %v2666_v13 = vpop.f32.mrb[35].mxu1  ;;  %2513 = vmatprep.subr.bf16.mxu1 %v2850_v41  ;;  %v2852_v44 = vld [vmem:[#allocation13 + $0x68] sm:$0xff]   ;;  %v2408_v57 = vld [vmem:[%s3911_s28] ss:$0 sm:$0xff]  ;;  %s2449_s28 = sshll.u32 %s3317_s0, 8  ;;  %s3203_s0 = smov [#allocation14]  }
 0xe01   : > { %s3110_s17 = sshll.u32 %s3203_s0, 4  ;;  %s3111_s17 = int_to_ptr.vmem [resolvable:$false] %s3110_s17 }
 0xe02   : > { %v1791_v1 = vadd.f32 %v2907_v0, %v1789_v63  ;;  %v3763_v2 = vadd.f32 %v2407_v60, %v1790_v62  ;;  %v2409_v63 = vld [vmem:[%s3912_s30] ss:$0 sm:$0xff]  ;;  %s3915_s30 = sld [smem:[#allocation30_spill]]  ;;  %s3112_s3 = scalar_lea.vmem %s3111_s17, 512 }
 0xe03   : > { %2514 = vmatpush3.bf16.msra.mxu1 %v2851_v42  ;;  %p3113_p13 = scmp.lt.s32.totalorder %s3797_s19, %s3111_s17  ;;  %p3114_p0 = scmp.lt.s32.totalorder %s3112_s3, %s3106_s8 }
 0xe04   : > { %1803 = vadd.xlane.f32.xlu1 %v3763_v2  ;;  %v3766_v3 = vadd.f32 %v2407_v60, %v1791_v1  ;;  %2515 = vmatprep.subr.bf16.mxu1 %v2852_v44 }
 0xe05   : > { %p3115_p2 = por %p3114_p0, %p3113_p13 }
 0xe07   : > { %p3116_p8 = pnand %p3115_p2, %p3109_p1 }
 0xe08   : > { %1805 = vadd.xlane.f32.xlu1 %v3766_v3  ;;  %s3802_s29 = scalar_lea.hbm %s3915_s30, %s2449_s28 }
 0xe91   : > { %v1804_v4 = vpop.xlane.xlu1 %1803 }
 0xe92   : > { %v1807_v5 = vmul.f32 0.0078125, %v1804_v4 }
 0xe94   : > { %v3770_v6 = vsub.f32 %v3763_v2, %v1807_v5  ;;  %v2853_v5 = vld [vmem:[#allocation13 + $0x28] sm:$0xff]  }
 0xe95   : > { %v1806_v7 = vpop.xlane.xlu1 %1805  ;;  %2516 = vmatpush3.bf16.msra.mxu1 %v2853_v5 }
 0xe96   : > { %v1808_v8 = vmul.f32 0.0078125, %v1806_v7  ;;  %v1811_v14 = vmul.f32 %v3770_v6, %v3770_v6  ;;  %v1839_v59 = vmul.f32 %v2408_v57, %v3770_v6  ;;  %v2854_v7 = vld [vmem:[#allocation13 + $0x70] sm:$0xff]   ;;  %v2856_v6 = vld [vmem:[#allocation13 + $0x78] sm:$0xff]  }
 0xe97   : > { %2517 = vmatprep.subr.bf16.mxu1 %v2854_v7 }
 0xe98   : > { %v3775_v9 = vsub.f32 %v3766_v3, %v1808_v8  ;;  %1813 = vadd.xlane.f32.xlu1 %v1811_v14  ;;  %v2855_v8 = vld [vmem:[#allocation13 + $0x30] sm:$0xff]   ;;  %v2857_v14 = vld [vmem:[#allocation13 + $0x38] sm:$0xff]  }
 0xe99   : > { %2518 = vmatpush3.bf16.msra.mxu1 %v2855_v8 }
 0xe9a   : > { %v1812_v10 = vmul.f32 %v3775_v9, %v3775_v9  ;;  %v1840_v60 = vmul.f32 %v2408_v57, %v3775_v9  ;;  %2519 = vmatprep.subr.bf16.mxu1 %v2856_v6  ;;  %v1874_v9 = vlaneseq }
 0xe9c   : > { %1815 = vadd.xlane.f32.xlu1 %v1812_v10  ;;  %v1875_v10 = vshrl.u32 %v1874_v9, 7 }
 0xe9d   : > { %2520 = vmatpush3.bf16.msra.mxu1 %v2857_v14 }
 0xe9e   : > { %v1876_v12 = vsub.s32 0, %v1875_v10  ;;  %v1880_v16 = vsub.s32 1, %v1875_v10 }
 0xea0   : > { %v1877_v17 = vrot.slane %v1872_v15, %v1876_v12  ;;  %v1881_v18 = vrot.slane %v1872_v15, %v1880_v16 }
 0xf25   : > { %v1814_v45 = vpop.xlane.xlu1 %1813 }
 0xf26   : > { %v1817_v46 = vmul.f32 0.007874016, %v1814_v45 }
 0xf28   : > { %2898 = vrsqrt.f32 %v1817_v46  ;;  %vm1821_vm7 = vcmp.eq.f32.partialorder %v1817_v46, inf  ;;  %v1824_v50 = vand.u32 2147483648, %v1817_v46  ;;  %vm1823_vm8 = vcmp.eq.f32.partialorder %v1817_v46, 0.0 }
 0xf29   : > { %v1816_v47 = vpop.xlane.xlu1 %1815 }
 0xf2a   : > { %v1818_v48 = vmul.f32 0.007874016, %v1816_v47 }
 0xf2c   : > { %2900 = vrsqrt.f32 %v1818_v48  ;;  %vm1828_vm9 = vcmp.eq.f32.partialorder %v1818_v48, inf  ;;  %v1831_v53 = vand.u32 2147483648, %v1818_v48  ;;  %vm1830_vm10 = vcmp.eq.f32.partialorder %v1818_v48, 0.0 }
 0xf32   : > { %v2899_v49 = vpop.eup %2898 }
 0xf33   : > { %v1820_v23 = vmul.f32 %v2899_v49, %v1817_v46 }
 0xf35   : > { %v1822_v51 = vsel %vm1821_vm7, %v1817_v46, %v1820_v23 }
 0xf36   : > { %v2901_v11 = vpop.eup %2900  ;;  %v1825_v40 = vsel %vm1823_vm8, %v1824_v50, %v1822_v51 }
 0xf37   : > { %v1841_v52 = vadd.f32 1e-06, %v1825_v40  ;;  %v1827_v43 = vmul.f32 %v2901_v11, %v1818_v48 }
 0xf39   : > { %2902 = vrcp.f32 %v1841_v52  ;;  %v1829_v54 = vsel %vm1828_vm9, %v1818_v48, %v1827_v43 }
 0xf3a   : > { %v1832_v55 = vsel %vm1830_vm10, %v1831_v53, %v1829_v54 }
 0xf3b   : > { %v1842_v56 = vadd.f32 1e-06, %v1832_v55 }
 0xf3d   : > { %2904 = vrcp.f32 %v1842_v56 }
 0xf43   : > { %v2903_v58 = vpop.eup %2902 }
 0xf44   : > { %v1844_v61 = vmul.f32 %v2903_v58, %v1839_v59 }
 0xf46   : > { %v1853_v0 = vadd.f32 %v2409_v63, %v1844_v61 }
 0xf47   : > { %v2905_v62 = vpop.eup %2904 }
 0xf48   : > { %v1846_v13 = vmul.f32 %v2905_v62, %v1840_v60 }
 0xf4a   : > { %v1854_v1 = vadd.f32 %v2409_v63, %v1846_v13 }
 0xf4c   : > { %v1855_v4 = vpack.c.bf16 %v1854_v1, %v1853_v0 }
 0xf4e   : > { %1997 = vmatmul.mubr.bf16.vlgmr.msra.gmra.mrb[24].mxu0 %v1855_v4 }
0x1021   : > { %v1998_v19 = vpop.f32.mrb[24].mxu0 }
0x1022   : > { %v1999_v20 = vadd.f32 %v1998_v19, %v1877_v17  ;;  %v2000_v21 = vpop.f32.mrb[25].mxu0 }
0x1023   : > { %v2001_v22 = vadd.f32 %v2000_v21, %v1881_v18  ;;  %v2002_v24 = vpop.f32.mrb[26].mxu0 }
0x1024   : > { %v2003_v25 = vadd.f32 %v2002_v24, %v1877_v17  ;;  %v2004_v26 = vpop.f32.mrb[27].mxu0  ;;  %v2007_v28 = vmax.f32 %v1999_v20, 0.0 }
0x1025   : > { %v2005_v27 = vadd.f32 %v2004_v26, %v1881_v18  ;;  %v2008_v30 = vmax.f32 %v2001_v22, 0.0 }
0x1026   : > { %v2009_v29 = vmax.f32 %v2003_v25, 0.0 }
0x1027   : > { %v2010_v31 = vmax.f32 %v2005_v27, 0.0 }
0x1028   : > { %v2011_v32 = vpack.c.bf16 %v2009_v29, %v2007_v28 }
0x1029   : > { %v2012_v33 = vpack.c.bf16 %v2010_v31, %v2008_v30 }
0x102b   : > { %2180 = vmatprep.mubr.bf16.mxu1 %v2012_v33 }
0x102c   : > { %2181 = vmatmul.mubr.bf16.vlgmr.msra.gmra.mrb[36].mxu1 %v2011_v32 }
0x10ff   : > { %v2521_v34 = vpop.f32.mrb[36].mxu1 }
0x1100   : > { %v2522_v36 = vpop.f32.mrb[37].mxu1 }
0x1101   : > { %v2523_v37 = vadd.f32 %v2522_v36, %v2521_v34  ;;  %v2524_v38 = vpop.f32.mrb[38].mxu1 }
0x1102   : > { %v2525_v39 = vpop.f32.mrb[39].mxu1 }
0x1103   : > { %v2183_v41 = vadd.f32 %v2523_v37, %v2426_v35  ;;  %v2526_v42 = vadd.f32 %v2525_v39, %v2524_v38 }
0x1105   : > { %v2189_v44 = vadd.f32 %v2183_v41, %v3763_v2  ;;  %v2186_v45 = vadd.f32 %v2526_v42, %v2426_v35 }
0x1107   : > { %2191 = vst [vmem:[%s653_s11] sm:$0xff] %v2189_v44  ;;  %v2190_v46 = vadd.f32 %v2186_v45, %v3766_v3 }
0x1109   : > { %2192 = vst [vmem:[%s653_s11 + $0x8] sm:$0xff] %v2190_v46 }
0x110a   : > { %3119 = shalt.err (!%p3116_p8)
}
0x110b   : > { %s3120_s7 = scalar_lea.hbm %s3802_s29, 256  ;;  %s3124_s28 = scalar_lea.hbm %s3915_s30, 512 }
0x110c   : > { %p3121_p4 = scmp.ne.s32.totalorder %s3802_s29, %s3120_s7  ;;  %p3125_p3 = scmp.lt.u32.totalorder %s3802_s29, %s3915_s30 }
0x110d   : > { %p3126_p5 = scmp.lt.u32.totalorder %s3124_s28, %s3120_s7  ;;  %p3128_p6 = scmp.lt.u32.totalorder %s3120_s7, %s3802_s29 }
0x110e   : > { %p3122_p10 = pnand %p3121_p4, %p3916_p9 }
0x110f   : > { %p3127_p7 = por %p3126_p5, %p3125_p3 }
0x1110   : > { %p3123_p11 = pneg %p3122_p10 }
0x1111   : > { %p3129_p12 = por %p3128_p6, %p3127_p7 }
0x1113   : > { %p3130_p1 = pnand %p3129_p12, %p3123_p11 }
0x1115   : > { %3133 = shalt.err (!%p3130_p1)
}
0x1116   : > { %s3204_s8 = smov 128   ;;  %s3205_s0 = smov 8  }
0x1117   : > { %2693 = dma.vmem_to_hbm [thread:$0]  (%p3916_p9), %s3797_s19, 256, %s3802_s29, %s2194_s1, %s3204_s8, %s3204_s8, %s3205_s0  }
0x1118 PF: > { %s2222_s17 = sand.u32 1, %s3172_s24   ;;  %p3917_p13 = scmp.ne.s32.totalorder %s3897_s20, 0 }
0x1119   : > { %p3918_p0 = scmp.ge.s32.totalorder %s3184_s27, 2  ;;  %s2223_s3 = scalar_lea.sflag [#allocation4], %s2222_s17 }
0x111b   : > { %p2719_p2 = pnand %p3918_p0, %p3917_p13 }
0x111d   : > { %3167 = dma.done.wait (!%p2719_p2), %s2223_s3, 256  }
0x111e   : > { %3169 = vsyncadd (!%p2719_p2), %s2223_s3, 4294967040  ;;  %p33_p8 = scmp.ge.s32.totalorder %s3490_s18, 4   ;;  %s3919_s24 = smov %s3176_s25 }
0x111f   : > { %s3920_s25 = smov %s3180_s26  ;;  %s3921_s26 = smov %s3501_s12 }
0x1120   : > { %s3922_s27 = smov %s3490_s18  ;;  %35 = sbr.rel (!%p33_p8) target bundleno = 20 (0x14), region = 157 }
0x1127   :  { %2228 = vsyncpa [#allocation3], 1 }
0x1128   :  { %2230 = vsyncpa [#allocation3 + $0x1], 1 }
0x1129   :  { %2231 = vsyncpa [#allocation6], 1 }
0x112a   :  { %2232 = vsyncpa [#allocation9], 1 }
0x112b   :  { %2233 = vsyncpa [#allocation12], 1 }
0x112c   :  { %2234 = vsyncpa [#allocation4], 1 }
0x112d   :  { %2236 = vsyncpa [#allocation4 + $0x1], 1 }

</bundles_post_ra>
